<compile_context>
chip_gen: v5e
topology: v5e:2x2
jax: 0.10.0
libtpu: 0.0.40
codegen_flags: <defaults>
</compile_context>

<pallas_src>
import functools

import jax
import jax.numpy as jnp
import numpy as np
from jax.experimental import pallas as pl
from jax.experimental.pallas import tpu as pltpu


def _mlstm_stack_kernel(x_ref, ch_prev_ref, w2_ref, wm_ref, b_ref, ch_out_ref,
                        *, num_units, num_layers):
    """Single invocation: unrolled loop over all layers.

    x_ref:       (B, U)        layer-0 input
    ch_prev_ref: (L, B, 2U)    packed [c_prev | h_prev] per layer
    w2_ref:      (L, 2U, 4U)   pre-scaled [wx ; wh] (K-stacked)
    wm_ref:      (2L, U, U)    pre-scaled wmx (index 2l) / wmh (index 2l+1)
    b_ref:       (L, 1, 4U)    biases
    ch_out_ref:  (L, B, 2U)    packed [c | h] per layer (output)
    """
    U = num_units

    inp = x_ref[...]                       # (B, U)
    for l in range(num_layers):            # static unroll (L is small)
        ch = ch_prev_ref[l]                # (B, 2U)
        c_prev = ch[:, :U]
        h_prev = ch[:, U:]

        # Stage 1: multiplicative gate m = (inp@wmx) * (h_prev@wmh)   (MXU)
        mx = jnp.dot(inp, wm_ref[2 * l], preferred_element_type=jnp.float32)
        mh = jnp.dot(h_prev, wm_ref[2 * l + 1],
                     preferred_element_type=jnp.float32)
        m = mx * mh                        # (B, U)

        # Stage 2: K-stacked matmul  z = [inp | m] @ [wx ; wh] + b     (MXU)
        lhs = jnp.concatenate([inp, m], axis=1)          # (B, 2U) = (8, 128)
        z = jnp.dot(lhs, w2_ref[l],
                    preferred_element_type=jnp.float32) + b_ref[l]  # (B, 4U)

        # Gates: one lane-dense sigmoid pass over full z, tanh on last quarter.
        s = jax.nn.sigmoid(z)
        i = s[:, 0 * U:1 * U]
        f = s[:, 1 * U:2 * U]
        o = s[:, 2 * U:3 * U]
        u = jnp.tanh(z[:, 3 * U:4 * U])

        c = f * c_prev + i * u
        h = o * jnp.tanh(c)

        ch_out_ref[l] = jnp.concatenate([c, h], axis=1)  # lane-dense (B, 2U)
        inp = h                                          # carry to next layer


def mlstm_stack_forward(x, state, layer_params, *, num_units):
    """x: (B, D); state = (c_prev, h_prev), each (L, B, num_units)."""
    c_prev, h_prev = state
    L, B, U = c_prev.shape
    assert U == num_units

    f32 = lambda a: jnp.asarray(a, jnp.float32)
    x = f32(x)
    D = x.shape[1]

    def norm_cols(w):
        # PyTorch F.normalize(w, dim=0, p=2): per-column L2 normalization.
        ss = jnp.sum(w * w, axis=0, keepdims=True)
        return w / jnp.maximum(jnp.sqrt(ss), 1e-12)

    # Fold normalization + gains into the weights once, in the wrapper (XLA).
    wx_eff, wh_eff, wmx_eff, wmh_eff = [], [], [], []
    for lp in layer_params:
        wx_eff.append(norm_cols(f32(lp["wx"])) * f32(lp["gx"])[None, :])
        wh_eff.append(norm_cols(f32(lp["wh"])) * f32(lp["gh"])[None, :])
        wmx_eff.append(norm_cols(f32(lp["wmx"])) * f32(lp["gmx"])[None, :])
        wmh_eff.append(norm_cols(f32(lp["wmh"])) * f32(lp["gmh"])[None, :])

    # If layer 0's input dim differs, zero-pad its features up to num_units.
    # Zero rows contribute nothing to the matmuls (and column norms were
    # computed before padding), so this is exact.
    if D != U:
        assert D < U, "layer-0 input wider than num_units not supported"
        x = jnp.pad(x, ((0, 0), (0, U - D)))
        wx_eff[0] = jnp.pad(wx_eff[0], ((0, U - D), (0, 0)))
        wmx_eff[0] = jnp.pad(wmx_eff[0], ((0, U - D), (0, 0)))

    # K-stack wx/wh: (L, 2U, 4U);  pack wmx/wmh: (2L, U, U).
    w2_s = jnp.stack([jnp.concatenate([wx_eff[l], wh_eff[l]], axis=0)
                      for l in range(L)])                       # (L, 2U, 4U)
    wm_s = jnp.stack([w for l in range(L)
                      for w in (wmx_eff[l], wmh_eff[l])])       # (2L, U, U)
    b_s = jnp.stack([f32(lp["b"]) for lp in layer_params])[:, None, :]  # (L,1,4U)

    # Lane-dense packed state: [c | h] along the last (128-lane) axis.
    ch_prev = jnp.concatenate([f32(c_prev), f32(h_prev)], axis=-1)  # (L, B, 2U)

    kernel = functools.partial(_mlstm_stack_kernel, num_units=U, num_layers=L)

    ch_out = pl.pallas_call(
        kernel,
        out_shape=jax.ShapeDtypeStruct((L, B, 2 * U), jnp.float32),
        grid_spec=pltpu.PrefetchScalarGridSpec(
            num_scalar_prefetch=0,
            grid=(1,),
            in_specs=[
                pl.BlockSpec((B, U), lambda i: (0, 0)),
                pl.BlockSpec((L, B, 2 * U), lambda i: (0, 0, 0)),
                pl.BlockSpec((L, 2 * U, 4 * U), lambda i: (0, 0, 0)),
                pl.BlockSpec((2 * L, U, U), lambda i: (0, 0, 0)),
                pl.BlockSpec((L, 1, 4 * U), lambda i: (0, 0, 0)),
            ],
            out_specs=pl.BlockSpec((L, B, 2 * U), lambda i: (0, 0, 0))),
        compiler_params=pltpu.CompilerParams(
            dimension_semantics=("arbitrary",)),
    )(x, ch_prev, w2_s, wm_s, b_s)

    cs_out = ch_out[..., :U]
    hs_out = ch_out[..., U:]
    final_output = hs_out[-1]
    new_cs = tuple(cs_out[i] for i in range(L))
    new_hs = tuple(hs_out[i] for i in range(L))
    return final_output, (new_cs, new_hs)


def mlstm_stack_reference(x, state, layer_params):
    """Pure-JAX reference mirroring the PyTorch forward."""
    c_prev, h_prev = state
    x = jnp.asarray(x, jnp.float32)

    def norm_cols(w):
        ss = jnp.sum(w * w, axis=0, keepdims=True)
        return w / jnp.maximum(jnp.sqrt(ss), 1e-12)

    inp = x
    cs, hs = [], []
    for l, lp in enumerate(layer_params):
        U = lp["wmh"].shape[1]
        wx = norm_cols(lp["wx"]) * lp["gx"][None, :]
        wh = norm_cols(lp["wh"]) * lp["gh"][None, :]
        wmx = norm_cols(lp["wmx"]) * lp["gmx"][None, :]
        wmh = norm_cols(lp["wmh"]) * lp["gmh"][None, :]
        m = (inp @ wmx) * (h_prev[l] @ wmh)
        z = inp @ wx + m @ wh + lp["b"][None, :]
        i = jax.nn.sigmoid(z[:, 0 * U:1 * U])
        f = jax.nn.sigmoid(z[:, 1 * U:2 * U])
        o = jax.nn.sigmoid(z[:, 2 * U:3 * U])
        u = jnp.tanh(z[:, 3 * U:4 * U])
        c = f * c_prev[l] + i * u
        h = o * jnp.tanh(c)
        cs.append(c)
        hs.append(h)
        inp = h
    return jnp.stack(cs), jnp.stack(hs)


if __name__ == "__main__":
    num_units, num_layers, batch = 64, 4, 8
    input_size = num_units   # stack layers all operate on num_units features

    key = jax.random.PRNGKey(0)
    layer_params = []
    for l in range(num_layers):
        key, *ks = jax.random.split(key, 10)
        d_in = input_size if l == 0 else num_units
        layer_params.append(dict(
            wx=0.10 * jax.random.normal(ks[0], (d_in, 4 * num_units), jnp.float32),
            wh=0.10 * jax.random.normal(ks[1], (num_units, 4 * num_units), jnp.float32),
            wmx=0.10 * jax.random.normal(ks[2], (d_in, num_units), jnp.float32),
            wmh=0.10 * jax.random.normal(ks[3], (num_units, num_units), jnp.float32),
            b=0.05 * jax.random.normal(ks[4], (4 * num_units,), jnp.float32),
            gx=1.0 + 0.10 * jax.random.normal(ks[5], (4 * num_units,), jnp.float32),
            gh=1.0 + 0.10 * jax.random.normal(ks[6], (4 * num_units,), jnp.float32),
            gmx=1.0 + 0.10 * jax.random.normal(ks[7], (num_units,), jnp.float32),
            gmh=1.0 + 0.10 * jax.random.normal(ks[8], (num_units,), jnp.float32),
        ))

    key, kx, kc, kh = jax.random.split(key, 4)
    x = jax.random.normal(kx, (batch, input_size), jnp.float32)
    c0 = 0.5 * jax.random.normal(kc, (num_layers, batch, num_units), jnp.float32)
    h0 = 0.5 * jax.random.normal(kh, (num_layers, batch, num_units), jnp.float32)

    final, (new_cs, new_hs) = mlstm_stack_forward(
        x, (c0, h0), layer_params, num_units=num_units)
    final = jax.block_until_ready(final)

    cs_ref, hs_ref = mlstm_stack_reference(x, (c0, h0), layer_params)
    np.testing.assert_allclose(np.asarray(jnp.stack(new_cs)), np.asarray(cs_ref),
                               rtol=1e-4, atol=1e-4)
    np.testing.assert_allclose(np.asarray(jnp.stack(new_hs)), np.asarray(hs_ref),
                               rtol=1e-4, atol=1e-4)
    np.testing.assert_allclose(np.asarray(final), np.asarray(hs_ref[-1]),
                               rtol=1e-4, atol=1e-4)
    print("KERNEL_OK")
</pallas_src>

<mosaic_0001>
module attributes {stable_mosaic.version = 11 : i64} {
  func.func @_mlstm_stack_kernel(%arg0: i32, %arg1: memref<8x64xf32, #tpu.memory_space<vmem>>, %arg2: memref<4x8x128xf32, #tpu.memory_space<vmem>>, %arg3: memref<4x128x256xf32, #tpu.memory_space<vmem>>, %arg4: memref<8x64x64xf32, #tpu.memory_space<vmem>>, %arg5: memref<4x1x256xf32, #tpu.memory_space<vmem>>, %arg6: memref<4x8x128xf32, #tpu.memory_space<vmem>>) attributes {dimension_semantics = [#tpu.dimension_semantics<arbitrary>], iteration_bounds = array<i64: 1>, scalar_prefetch = 0 : i64, scratch_operands = 0 : i64, tpu.core_type = #tpu.core_type<tc>, window_params = [{pipeline_mode = #tpu.pipeline_mode<synchronous>, transform_indices = @transform_0, window_bounds = array<i64: 8, 64>}, {pipeline_mode = #tpu.pipeline_mode<synchronous>, transform_indices = @transform_1, window_bounds = array<i64: 4, 8, 128>}, {pipeline_mode = #tpu.pipeline_mode<synchronous>, transform_indices = @transform_2, window_bounds = array<i64: 4, 128, 256>}, {pipeline_mode = #tpu.pipeline_mode<synchronous>, transform_indices = @transform_3, window_bounds = array<i64: 8, 64, 64>}, {pipeline_mode = #tpu.pipeline_mode<synchronous>, transform_indices = @transform_4, window_bounds = array<i64: 4, 1, 256>}, {pipeline_mode = #tpu.pipeline_mode<synchronous>, transform_indices = @transform_5, window_bounds = array<i64: 4, 8, 128>}]} {
    %c0 = arith.constant 0 : index
    %c0_0 = arith.constant 0 : index
    %0 = vector.load %arg1[%c0, %c0_0] : memref<8x64xf32, #tpu.memory_space<vmem>>, vector<8x64xf32>
    %c0_1 = arith.constant 0 : index
    %c0_2 = arith.constant 0 : index
    %c0_3 = arith.constant 0 : index
    %1 = vector.load %arg2[%c0_1, %c0_2, %c0_3] : memref<4x8x128xf32, #tpu.memory_space<vmem>>, vector<1x8x128xf32>
    %2 = vector.shape_cast %1 : vector<1x8x128xf32> to vector<8x128xf32>
    %3 = vector.extract_strided_slice %2 {offsets = [0, 0], sizes = [8, 64], strides = [1, 1]} : vector<8x128xf32> to vector<8x64xf32>
    %4 = vector.extract_strided_slice %2 {offsets = [0, 64], sizes = [8, 64], strides = [1, 1]} : vector<8x128xf32> to vector<8x64xf32>
    %c0_4 = arith.constant 0 : index
    %c0_5 = arith.constant 0 : index
    %c0_6 = arith.constant 0 : index
    %5 = vector.load %arg4[%c0_4, %c0_5, %c0_6] : memref<8x64x64xf32, #tpu.memory_space<vmem>>, vector<1x64x64xf32>
    %6 = vector.shape_cast %5 : vector<1x64x64xf32> to vector<64x64xf32>
    %cst = arith.constant dense<0.000000e+00> : vector<8x64xf32>
    %7 = tpu.matmul %0, %6, %cst {dimension_numbers = #tpu.dot_dimension_numbers<[1], [0], [0], [1], [0, 0, 1, 1], [], []>} : vector<8x64xf32>, vector<64x64xf32>, vector<8x64xf32> -> vector<8x64xf32>
    %c1 = arith.constant 1 : index
    %c0_7 = arith.constant 0 : index
    %c0_8 = arith.constant 0 : index
    %8 = vector.load %arg4[%c1, %c0_7, %c0_8] : memref<8x64x64xf32, #tpu.memory_space<vmem>>, vector<1x64x64xf32>
    %9 = vector.shape_cast %8 : vector<1x64x64xf32> to vector<64x64xf32>
    %cst_9 = arith.constant dense<0.000000e+00> : vector<8x64xf32>
    %10 = tpu.matmul %4, %9, %cst_9 {dimension_numbers = #tpu.dot_dimension_numbers<[1], [0], [0], [1], [0, 0, 1, 1], [], []>} : vector<8x64xf32>, vector<64x64xf32>, vector<8x64xf32> -> vector<8x64xf32>
    %11 = arith.mulf %7, %10 : vector<8x64xf32>
    %12 = tpu.concatenate %0, %11 in 1 : vector<8x64xf32>, vector<8x64xf32> -> vector<8x128xf32>
    %c0_10 = arith.constant 0 : index
    %c0_11 = arith.constant 0 : index
    %c0_12 = arith.constant 0 : index
    %13 = vector.load %arg3[%c0_10, %c0_11, %c0_12] : memref<4x128x256xf32, #tpu.memory_space<vmem>>, vector<1x128x256xf32>
    %14 = vector.shape_cast %13 : vector<1x128x256xf32> to vector<128x256xf32>
    %cst_13 = arith.constant dense<0.000000e+00> : vector<8x256xf32>
    %15 = tpu.matmul %12, %14, %cst_13 {dimension_numbers = #tpu.dot_dimension_numbers<[1], [0], [0], [1], [0, 0, 1, 1], [], []>} : vector<8x128xf32>, vector<128x256xf32>, vector<8x256xf32> -> vector<8x256xf32>
    %c0_14 = arith.constant 0 : index
    %c0_15 = arith.constant 0 : index
    %c0_16 = arith.constant 0 : index
    %16 = vector.load %arg5[%c0_14, %c0_15, %c0_16] : memref<4x1x256xf32, #tpu.memory_space<vmem>>, vector<1x1x256xf32>
    %17 = vector.shape_cast %16 : vector<1x1x256xf32> to vector<1x256xf32>
    %18 = vector.broadcast %17 : vector<1x256xf32> to vector<8x256xf32>
    %19 = arith.addf %15, %18 : vector<8x256xf32>
    %20 = arith.negf %19 : vector<8x256xf32>
    %21 = math.exp %20 : vector<8x256xf32>
    %cst_17 = arith.constant 1.000000e+00 : f32
    %22 = vector.broadcast %cst_17 : f32 to vector<8x256xf32>
    %23 = arith.addf %22, %21 : vector<8x256xf32>
    %24 = arith.divf %22, %23 : vector<8x256xf32>
    %25 = vector.extract_strided_slice %24 {offsets = [0, 0], sizes = [8, 64], strides = [1, 1]} : vector<8x256xf32> to vector<8x64xf32>
    %26 = vector.extract_strided_slice %24 {offsets = [0, 64], sizes = [8, 64], strides = [1, 1]} : vector<8x256xf32> to vector<8x64xf32>
    %27 = vector.extract_strided_slice %24 {offsets = [0, 128], sizes = [8, 64], strides = [1, 1]} : vector<8x256xf32> to vector<8x64xf32>
    %28 = vector.extract_strided_slice %19 {offsets = [0, 192], sizes = [8, 64], strides = [1, 1]} : vector<8x256xf32> to vector<8x64xf32>
    %29 = math.tanh %28 : vector<8x64xf32>
    %30 = arith.mulf %26, %3 : vector<8x64xf32>
    %31 = arith.mulf %25, %29 : vector<8x64xf32>
    %32 = arith.addf %30, %31 : vector<8x64xf32>
    %33 = math.tanh %32 : vector<8x64xf32>
    %34 = arith.mulf %27, %33 : vector<8x64xf32>
    %35 = tpu.concatenate %32, %34 in 1 : vector<8x64xf32>, vector<8x64xf32> -> vector<8x128xf32>
    %c0_18 = arith.constant 0 : index
    %c0_19 = arith.constant 0 : index
    %c0_20 = arith.constant 0 : index
    %36 = vector.load %arg6[%c0_18, %c0_19, %c0_20] : memref<4x8x128xf32, #tpu.memory_space<vmem>>, vector<1x8x128xf32>
    %37 = vector.shape_cast %36 : vector<1x8x128xf32> to vector<8x128xf32>
    %38 = vector.shape_cast %35 : vector<8x128xf32> to vector<1x8x128xf32>
    tpu.vector_store %arg6[%c0_18, %c0_19, %c0_20], %38 {strides = array<i32>} : memref<4x8x128xf32, #tpu.memory_space<vmem>>, vector<1x8x128xf32>,
    %c1_21 = arith.constant 1 : index
    %c0_22 = arith.constant 0 : index
    %c0_23 = arith.constant 0 : index
    %39 = vector.load %arg2[%c1_21, %c0_22, %c0_23] : memref<4x8x128xf32, #tpu.memory_space<vmem>>, vector<1x8x128xf32>
    %40 = vector.shape_cast %39 : vector<1x8x128xf32> to vector<8x128xf32>
    %41 = vector.extract_strided_slice %40 {offsets = [0, 0], sizes = [8, 64], strides = [1, 1]} : vector<8x128xf32> to vector<8x64xf32>
    %42 = vector.extract_strided_slice %40 {offsets = [0, 64], sizes = [8, 64], strides = [1, 1]} : vector<8x128xf32> to vector<8x64xf32>
    %c2 = arith.constant 2 : index
    %c0_24 = arith.constant 0 : index
    %c0_25 = arith.constant 0 : index
    %43 = vector.load %arg4[%c2, %c0_24, %c0_25] : memref<8x64x64xf32, #tpu.memory_space<vmem>>, vector<1x64x64xf32>
    %44 = vector.shape_cast %43 : vector<1x64x64xf32> to vector<64x64xf32>
    %cst_26 = arith.constant dense<0.000000e+00> : vector<8x64xf32>
    %45 = tpu.matmul %34, %44, %cst_26 {dimension_numbers = #tpu.dot_dimension_numbers<[1], [0], [0], [1], [0, 0, 1, 1], [], []>} : vector<8x64xf32>, vector<64x64xf32>, vector<8x64xf32> -> vector<8x64xf32>
    %c3 = arith.constant 3 : index
    %c0_27 = arith.constant 0 : index
    %c0_28 = arith.constant 0 : index
    %46 = vector.load %arg4[%c3, %c0_27, %c0_28] : memref<8x64x64xf32, #tpu.memory_space<vmem>>, vector<1x64x64xf32>
    %47 = vector.shape_cast %46 : vector<1x64x64xf32> to vector<64x64xf32>
    %cst_29 = arith.constant dense<0.000000e+00> : vector<8x64xf32>
    %48 = tpu.matmul %42, %47, %cst_29 {dimension_numbers = #tpu.dot_dimension_numbers<[1], [0], [0], [1], [0, 0, 1, 1], [], []>} : vector<8x64xf32>, vector<64x64xf32>, vector<8x64xf32> -> vector<8x64xf32>
    %49 = arith.mulf %45, %48 : vector<8x64xf32>
    %50 = tpu.concatenate %34, %49 in 1 : vector<8x64xf32>, vector<8x64xf32> -> vector<8x128xf32>
    %c1_30 = arith.constant 1 : index
    %c0_31 = arith.constant 0 : index
    %c0_32 = arith.constant 0 : index
    %51 = vector.load %arg3[%c1_30, %c0_31, %c0_32] : memref<4x128x256xf32, #tpu.memory_space<vmem>>, vector<1x128x256xf32>
    %52 = vector.shape_cast %51 : vector<1x128x256xf32> to vector<128x256xf32>
    %cst_33 = arith.constant dense<0.000000e+00> : vector<8x256xf32>
    %53 = tpu.matmul %50, %52, %cst_33 {dimension_numbers = #tpu.dot_dimension_numbers<[1], [0], [0], [1], [0, 0, 1, 1], [], []>} : vector<8x128xf32>, vector<128x256xf32>, vector<8x256xf32> -> vector<8x256xf32>
    %c1_34 = arith.constant 1 : index
    %c0_35 = arith.constant 0 : index
    %c0_36 = arith.constant 0 : index
    %54 = vector.load %arg5[%c1_34, %c0_35, %c0_36] : memref<4x1x256xf32, #tpu.memory_space<vmem>>, vector<1x1x256xf32>
    %55 = vector.shape_cast %54 : vector<1x1x256xf32> to vector<1x256xf32>
    %56 = vector.broadcast %55 : vector<1x256xf32> to vector<8x256xf32>
    %57 = arith.addf %53, %56 : vector<8x256xf32>
    %58 = arith.negf %57 : vector<8x256xf32>
    %59 = math.exp %58 : vector<8x256xf32>
    %cst_37 = arith.constant 1.000000e+00 : f32
    %60 = vector.broadcast %cst_37 : f32 to vector<8x256xf32>
    %61 = arith.addf %60, %59 : vector<8x256xf32>
    %62 = arith.divf %60, %61 : vector<8x256xf32>
    %63 = vector.extract_strided_slice %62 {offsets = [0, 0], sizes = [8, 64], strides = [1, 1]} : vector<8x256xf32> to vector<8x64xf32>
    %64 = vector.extract_strided_slice %62 {offsets = [0, 64], sizes = [8, 64], strides = [1, 1]} : vector<8x256xf32> to vector<8x64xf32>
    %65 = vector.extract_strided_slice %62 {offsets = [0, 128], sizes = [8, 64], strides = [1, 1]} : vector<8x256xf32> to vector<8x64xf32>
    %66 = vector.extract_strided_slice %57 {offsets = [0, 192], sizes = [8, 64], strides = [1, 1]} : vector<8x256xf32> to vector<8x64xf32>
    %67 = math.tanh %66 : vector<8x64xf32>
    %68 = arith.mulf %64, %41 : vector<8x64xf32>
    %69 = arith.mulf %63, %67 : vector<8x64xf32>
    %70 = arith.addf %68, %69 : vector<8x64xf32>
    %71 = math.tanh %70 : vector<8x64xf32>
    %72 = arith.mulf %65, %71 : vector<8x64xf32>
    %73 = tpu.concatenate %70, %72 in 1 : vector<8x64xf32>, vector<8x64xf32> -> vector<8x128xf32>
    %c1_38 = arith.constant 1 : index
    %c0_39 = arith.constant 0 : index
    %c0_40 = arith.constant 0 : index
    %74 = vector.load %arg6[%c1_38, %c0_39, %c0_40] : memref<4x8x128xf32, #tpu.memory_space<vmem>>, vector<1x8x128xf32>
    %75 = vector.shape_cast %74 : vector<1x8x128xf32> to vector<8x128xf32>
    %76 = vector.shape_cast %73 : vector<8x128xf32> to vector<1x8x128xf32>
    tpu.vector_store %arg6[%c1_38, %c0_39, %c0_40], %76 {strides = array<i32>} : memref<4x8x128xf32, #tpu.memory_space<vmem>>, vector<1x8x128xf32>,
    %c2_41 = arith.constant 2 : index
    %c0_42 = arith.constant 0 : index
    %c0_43 = arith.constant 0 : index
    %77 = vector.load %arg2[%c2_41, %c0_42, %c0_43] : memref<4x8x128xf32, #tpu.memory_space<vmem>>, vector<1x8x128xf32>
    %78 = vector.shape_cast %77 : vector<1x8x128xf32> to vector<8x128xf32>
    %79 = vector.extract_strided_slice %78 {offsets = [0, 0], sizes = [8, 64], strides = [1, 1]} : vector<8x128xf32> to vector<8x64xf32>
    %80 = vector.extract_strided_slice %78 {offsets = [0, 64], sizes = [8, 64], strides = [1, 1]} : vector<8x128xf32> to vector<8x64xf32>
    %c4 = arith.constant 4 : index
    %c0_44 = arith.constant 0 : index
    %c0_45 = arith.constant 0 : index
    %81 = vector.load %arg4[%c4, %c0_44, %c0_45] : memref<8x64x64xf32, #tpu.memory_space<vmem>>, vector<1x64x64xf32>
    %82 = vector.shape_cast %81 : vector<1x64x64xf32> to vector<64x64xf32>
    %cst_46 = arith.constant dense<0.000000e+00> : vector<8x64xf32>
    %83 = tpu.matmul %72, %82, %cst_46 {dimension_numbers = #tpu.dot_dimension_numbers<[1], [0], [0], [1], [0, 0, 1, 1], [], []>} : vector<8x64xf32>, vector<64x64xf32>, vector<8x64xf32> -> vector<8x64xf32>
    %c5 = arith.constant 5 : index
    %c0_47 = arith.constant 0 : index
    %c0_48 = arith.constant 0 : index
    %84 = vector.load %arg4[%c5, %c0_47, %c0_48] : memref<8x64x64xf32, #tpu.memory_space<vmem>>, vector<1x64x64xf32>
    %85 = vector.shape_cast %84 : vector<1x64x64xf32> to vector<64x64xf32>
    %cst_49 = arith.constant dense<0.000000e+00> : vector<8x64xf32>
    %86 = tpu.matmul %80, %85, %cst_49 {dimension_numbers = #tpu.dot_dimension_numbers<[1], [0], [0], [1], [0, 0, 1, 1], [], []>} : vector<8x64xf32>, vector<64x64xf32>, vector<8x64xf32> -> vector<8x64xf32>
    %87 = arith.mulf %83, %86 : vector<8x64xf32>
    %88 = tpu.concatenate %72, %87 in 1 : vector<8x64xf32>, vector<8x64xf32> -> vector<8x128xf32>
    %c2_50 = arith.constant 2 : index
    %c0_51 = arith.constant 0 : index
    %c0_52 = arith.constant 0 : index
    %89 = vector.load %arg3[%c2_50, %c0_51, %c0_52] : memref<4x128x256xf32, #tpu.memory_space<vmem>>, vector<1x128x256xf32>
    %90 = vector.shape_cast %89 : vector<1x128x256xf32> to vector<128x256xf32>
    %cst_53 = arith.constant dense<0.000000e+00> : vector<8x256xf32>
    %91 = tpu.matmul %88, %90, %cst_53 {dimension_numbers = #tpu.dot_dimension_numbers<[1], [0], [0], [1], [0, 0, 1, 1], [], []>} : vector<8x128xf32>, vector<128x256xf32>, vector<8x256xf32> -> vector<8x256xf32>
    %c2_54 = arith.constant 2 : index
    %c0_55 = arith.constant 0 : index
    %c0_56 = arith.constant 0 : index
    %92 = vector.load %arg5[%c2_54, %c0_55, %c0_56] : memref<4x1x256xf32, #tpu.memory_space<vmem>>, vector<1x1x256xf32>
    %93 = vector.shape_cast %92 : vector<1x1x256xf32> to vector<1x256xf32>
    %94 = vector.broadcast %93 : vector<1x256xf32> to vector<8x256xf32>
    %95 = arith.addf %91, %94 : vector<8x256xf32>
    %96 = arith.negf %95 : vector<8x256xf32>
    %97 = math.exp %96 : vector<8x256xf32>
    %cst_57 = arith.constant 1.000000e+00 : f32
    %98 = vector.broadcast %cst_57 : f32 to vector<8x256xf32>
    %99 = arith.addf %98, %97 : vector<8x256xf32>
    %100 = arith.divf %98, %99 : vector<8x256xf32>
    %101 = vector.extract_strided_slice %100 {offsets = [0, 0], sizes = [8, 64], strides = [1, 1]} : vector<8x256xf32> to vector<8x64xf32>
    %102 = vector.extract_strided_slice %100 {offsets = [0, 64], sizes = [8, 64], strides = [1, 1]} : vector<8x256xf32> to vector<8x64xf32>
    %103 = vector.extract_strided_slice %100 {offsets = [0, 128], sizes = [8, 64], strides = [1, 1]} : vector<8x256xf32> to vector<8x64xf32>
    %104 = vector.extract_strided_slice %95 {offsets = [0, 192], sizes = [8, 64], strides = [1, 1]} : vector<8x256xf32> to vector<8x64xf32>
    %105 = math.tanh %104 : vector<8x64xf32>
    %106 = arith.mulf %102, %79 : vector<8x64xf32>
    %107 = arith.mulf %101, %105 : vector<8x64xf32>
    %108 = arith.addf %106, %107 : vector<8x64xf32>
    %109 = math.tanh %108 : vector<8x64xf32>
    %110 = arith.mulf %103, %109 : vector<8x64xf32>
    %111 = tpu.concatenate %108, %110 in 1 : vector<8x64xf32>, vector<8x64xf32> -> vector<8x128xf32>
    %c2_58 = arith.constant 2 : index
    %c0_59 = arith.constant 0 : index
    %c0_60 = arith.constant 0 : index
    %112 = vector.load %arg6[%c2_58, %c0_59, %c0_60] : memref<4x8x128xf32, #tpu.memory_space<vmem>>, vector<1x8x128xf32>
    %113 = vector.shape_cast %112 : vector<1x8x128xf32> to vector<8x128xf32>
    %114 = vector.shape_cast %111 : vector<8x128xf32> to vector<1x8x128xf32>
    tpu.vector_store %arg6[%c2_58, %c0_59, %c0_60], %114 {strides = array<i32>} : memref<4x8x128xf32, #tpu.memory_space<vmem>>, vector<1x8x128xf32>,
    %c3_61 = arith.constant 3 : index
    %c0_62 = arith.constant 0 : index
    %c0_63 = arith.constant 0 : index
    %115 = vector.load %arg2[%c3_61, %c0_62, %c0_63] : memref<4x8x128xf32, #tpu.memory_space<vmem>>, vector<1x8x128xf32>
    %116 = vector.shape_cast %115 : vector<1x8x128xf32> to vector<8x128xf32>
    %117 = vector.extract_strided_slice %116 {offsets = [0, 0], sizes = [8, 64], strides = [1, 1]} : vector<8x128xf32> to vector<8x64xf32>
    %118 = vector.extract_strided_slice %116 {offsets = [0, 64], sizes = [8, 64], strides = [1, 1]} : vector<8x128xf32> to vector<8x64xf32>
    %c6 = arith.constant 6 : index
    %c0_64 = arith.constant 0 : index
    %c0_65 = arith.constant 0 : index
    %119 = vector.load %arg4[%c6, %c0_64, %c0_65] : memref<8x64x64xf32, #tpu.memory_space<vmem>>, vector<1x64x64xf32>
    %120 = vector.shape_cast %119 : vector<1x64x64xf32> to vector<64x64xf32>
    %cst_66 = arith.constant dense<0.000000e+00> : vector<8x64xf32>
    %121 = tpu.matmul %110, %120, %cst_66 {dimension_numbers = #tpu.dot_dimension_numbers<[1], [0], [0], [1], [0, 0, 1, 1], [], []>} : vector<8x64xf32>, vector<64x64xf32>, vector<8x64xf32> -> vector<8x64xf32>
    %c7 = arith.constant 7 : index
    %c0_67 = arith.constant 0 : index
    %c0_68 = arith.constant 0 : index
    %122 = vector.load %arg4[%c7, %c0_67, %c0_68] : memref<8x64x64xf32, #tpu.memory_space<vmem>>, vector<1x64x64xf32>
    %123 = vector.shape_cast %122 : vector<1x64x64xf32> to vector<64x64xf32>
    %cst_69 = arith.constant dense<0.000000e+00> : vector<8x64xf32>
    %124 = tpu.matmul %118, %123, %cst_69 {dimension_numbers = #tpu.dot_dimension_numbers<[1], [0], [0], [1], [0, 0, 1, 1], [], []>} : vector<8x64xf32>, vector<64x64xf32>, vector<8x64xf32> -> vector<8x64xf32>
    %125 = arith.mulf %121, %124 : vector<8x64xf32>
    %126 = tpu.concatenate %110, %125 in 1 : vector<8x64xf32>, vector<8x64xf32> -> vector<8x128xf32>
    %c3_70 = arith.constant 3 : index
    %c0_71 = arith.constant 0 : index
    %c0_72 = arith.constant 0 : index
    %127 = vector.load %arg3[%c3_70, %c0_71, %c0_72] : memref<4x128x256xf32, #tpu.memory_space<vmem>>, vector<1x128x256xf32>
    %128 = vector.shape_cast %127 : vector<1x128x256xf32> to vector<128x256xf32>
    %cst_73 = arith.constant dense<0.000000e+00> : vector<8x256xf32>
    %129 = tpu.matmul %126, %128, %cst_73 {dimension_numbers = #tpu.dot_dimension_numbers<[1], [0], [0], [1], [0, 0, 1, 1], [], []>} : vector<8x128xf32>, vector<128x256xf32>, vector<8x256xf32> -> vector<8x256xf32>
    %c3_74 = arith.constant 3 : index
    %c0_75 = arith.constant 0 : index
    %c0_76 = arith.constant 0 : index
    %130 = vector.load %arg5[%c3_74, %c0_75, %c0_76] : memref<4x1x256xf32, #tpu.memory_space<vmem>>, vector<1x1x256xf32>
    %131 = vector.shape_cast %130 : vector<1x1x256xf32> to vector<1x256xf32>
    %132 = vector.broadcast %131 : vector<1x256xf32> to vector<8x256xf32>
    %133 = arith.addf %129, %132 : vector<8x256xf32>
    %134 = arith.negf %133 : vector<8x256xf32>
    %135 = math.exp %134 : vector<8x256xf32>
    %cst_77 = arith.constant 1.000000e+00 : f32
    %136 = vector.broadcast %cst_77 : f32 to vector<8x256xf32>
    %137 = arith.addf %136, %135 : vector<8x256xf32>
    %138 = arith.divf %136, %137 : vector<8x256xf32>
    %139 = vector.extract_strided_slice %138 {offsets = [0, 0], sizes = [8, 64], strides = [1, 1]} : vector<8x256xf32> to vector<8x64xf32>
    %140 = vector.extract_strided_slice %138 {offsets = [0, 64], sizes = [8, 64], strides = [1, 1]} : vector<8x256xf32> to vector<8x64xf32>
    %141 = vector.extract_strided_slice %138 {offsets = [0, 128], sizes = [8, 64], strides = [1, 1]} : vector<8x256xf32> to vector<8x64xf32>
    %142 = vector.extract_strided_slice %133 {offsets = [0, 192], sizes = [8, 64], strides = [1, 1]} : vector<8x256xf32> to vector<8x64xf32>
    %143 = math.tanh %142 : vector<8x64xf32>
    %144 = arith.mulf %140, %117 : vector<8x64xf32>
    %145 = arith.mulf %139, %143 : vector<8x64xf32>
    %146 = arith.addf %144, %145 : vector<8x64xf32>
    %147 = math.tanh %146 : vector<8x64xf32>
    %148 = arith.mulf %141, %147 : vector<8x64xf32>
    %149 = tpu.concatenate %146, %148 in 1 : vector<8x64xf32>, vector<8x64xf32> -> vector<8x128xf32>
    %c3_78 = arith.constant 3 : index
    %c0_79 = arith.constant 0 : index
    %c0_80 = arith.constant 0 : index
    %150 = vector.load %arg6[%c3_78, %c0_79, %c0_80] : memref<4x8x128xf32, #tpu.memory_space<vmem>>, vector<1x8x128xf32>
    %151 = vector.shape_cast %150 : vector<1x8x128xf32> to vector<8x128xf32>
    %152 = vector.shape_cast %149 : vector<8x128xf32> to vector<1x8x128xf32>
    tpu.vector_store %arg6[%c3_78, %c0_79, %c0_80], %152 {strides = array<i32>} : memref<4x8x128xf32, #tpu.memory_space<vmem>>, vector<1x8x128xf32>,
    return
  }
  func.func @transform_0(%arg0: i32) -> (i32, i32) {
    %c0_i32 = arith.constant 0 : i32
    %c0_i32_0 = arith.constant 0 : i32
    %c0_i32_1 = arith.constant 0 : i32
    return %c0_i32, %c0_i32_0 : i32, i32
  }
  func.func @transform_1(%arg0: i32) -> (i32, i32, i32) {
    %c0_i32 = arith.constant 0 : i32
    %c0_i32_0 = arith.constant 0 : i32
    %c0_i32_1 = arith.constant 0 : i32
    %c0_i32_2 = arith.constant 0 : i32
    return %c0_i32, %c0_i32_0, %c0_i32_1 : i32, i32, i32
  }
  func.func @transform_2(%arg0: i32) -> (i32, i32, i32) {
    %c0_i32 = arith.constant 0 : i32
    %c0_i32_0 = arith.constant 0 : i32
    %c0_i32_1 = arith.constant 0 : i32
    %c0_i32_2 = arith.constant 0 : i32
    return %c0_i32, %c0_i32_0, %c0_i32_1 : i32, i32, i32
  }
  func.func @transform_3(%arg0: i32) -> (i32, i32, i32) {
    %c0_i32 = arith.constant 0 : i32
    %c0_i32_0 = arith.constant 0 : i32
    %c0_i32_1 = arith.constant 0 : i32
    %c0_i32_2 = arith.constant 0 : i32
    return %c0_i32, %c0_i32_0, %c0_i32_1 : i32, i32, i32
  }
  func.func @transform_4(%arg0: i32) -> (i32, i32, i32) {
    %c0_i32 = arith.constant 0 : i32
    %c0_i32_0 = arith.constant 0 : i32
    %c0_i32_1 = arith.constant 0 : i32
    %c0_i32_2 = arith.constant 0 : i32
    return %c0_i32, %c0_i32_0, %c0_i32_1 : i32, i32, i32
  }
  func.func @transform_5(%arg0: i32) -> (i32, i32, i32) {
    %c0_i32 = arith.constant 0 : i32
    %c0_i32_0 = arith.constant 0 : i32
    %c0_i32_1 = arith.constant 0 : i32
    %c0_i32_2 = arith.constant 0 : i32
    return %c0_i32, %c0_i32_0, %c0_i32_1 : i32, i32, i32
  }
}

</mosaic_0001>

<bundles_post_ra>
// kernel: tpu_custom_call.1
= control target key start
LH: loop header
LB: loop body
LE: loop exit
PB: predicated region body
PF: predicated region fallthrough
CT: control target
= control target key end

     0   :  { %10 = vsyncpa [#allocation3], 0  ;;  %s1398_s0 = inlined_call_operand.hbm [shape: f32[8,64], index: 0, kind: input, shape index: {}]   ;;  %s1399_s1 = inlined_call_operand.hbm [shape: f32[4,8,128], index: 1, kind: input, shape index: {}]   ;;  %s1400_s2 = inlined_call_operand.hbm [shape: f32[4,128,256], index: 2, kind: input, shape index: {}]   ;;  %s1401_s3 = inlined_call_operand.hbm [shape: f32[8,64,64], index: 3, kind: input, shape index: {}]   ;;  %s1402_s4 = inlined_call_operand.hbm [shape: f32[4,1,256], index: 4, kind: input, shape index: {}]   ;;  %s1403_s5 = inlined_call_operand.hbm [shape: f32[4,8,128], index: 5, kind: output, shape index: {}]  }
   0x1   :  { %11 = vsyncpa [#allocation6], 0 }
   0x2   :  { %12 = vsyncpa [#allocation9], 0  ;;  %s29_s20 = sshll.u32 %s1399_s1, 4  ;;  %s30_s20 = int_to_ptr.hbm [resolvable:$true] %s29_s20 }
   0x3   :  { %13 = vsyncpa [#allocation4], 0  ;;  %s1229_s21 = smov [#allocation5]   ;;  %s55_s25 = sshll.u32 %s1401_s3, 4  ;;  %s56_s25 = int_to_ptr.hbm [resolvable:$true] %s55_s25 }
   0x4   :  { %s31_s22 = sshll.u32 %s1229_s21, 4  ;;  %s1230_s26 = smov 128   ;;  %s32_s22 = int_to_ptr.vmem [resolvable:$true] %s31_s22 }
   0x5   :  { %s1231_s27 = smov 8   ;;  %s1232_s28 = smov [#allocation8]  }
   0x6   :  { %37 = dma.hbm_to_vmem [thread:$0]  %s30_s20, 512, %s32_s22, [#allocation6], %s1230_s26, %s1230_s26, %s1231_s27  }
   0x7   :  { %s57_s29 = sshll.u32 %s1232_s28, 4  ;;  %s19_s6 = sshll.u32 %s1398_s0, 4  ;;  %s58_s29 = int_to_ptr.vmem [resolvable:$true] %s57_s29  ;;  %s20_s6 = int_to_ptr.hbm [resolvable:$true] %s19_s6 }
   0x8   :  { %63 = dma.hbm_to_vmem [thread:$0]  %s56_s25, 8192, %s58_s29, [#allocation9], %s1230_s26, %s1230_s26, %s1231_s27  }
   0x9   :  { %s42_s8 = sshll.u32 %s1400_s2, 4  ;;  %s1233_s9 = smov [#allocation2]   ;;  %s43_s8 = int_to_ptr.hbm [resolvable:$true] %s42_s8 }
   0xa   :  { %s21_s10 = sshll.u32 %s1233_s9, 4  ;;  %s1234_s11 = smov [#allocation7]   ;;  %s22_s10 = int_to_ptr.vmem [resolvable:$true] %s21_s10 }
   0xb   :  { %24 = dma.hbm_to_vmem [thread:$0]  %s20_s6, 128, %s22_s10, [#allocation3]  }
   0xc   :  { %s44_s12 = sshll.u32 %s1234_s11, 4  ;;  %s1235_s13 = smov 256   ;;  %s45_s12 = int_to_ptr.vmem [resolvable:$true] %s44_s12 }
   0xd   :  { %s1236_s0 = smov 16   ;;  %s68_s16 = sshll.u32 %s1402_s4, 4  ;;  %s69_s16 = int_to_ptr.hbm [resolvable:$true] %s68_s16 }
   0xe   :  { %50 = dma.hbm_to_vmem [thread:$0]  %s43_s8, 16384, %s45_s12, [#allocation6], %s1235_s13, %s1235_s13, %s1236_s0  }
   0xf   :  { %s1237_s17 = smov [#allocation10]   ;;  %s1238_s2 = smov 32  }
  0x10   :  { %s70_s18 = sshll.u32 %s1237_s17, 4  ;;  %s1239_s19 = smov 2   ;;  %s71_s18 = int_to_ptr.vmem [resolvable:$true] %s70_s18 }
  0x11   :  { %76 = dma.hbm_to_vmem [thread:$0]  %s69_s16, 128, %s71_s18, [#allocation9], %s1238_s2, %s1238_s2, %s1239_s19  }
  0x12   :  { %1221 = dma.done.wait [#allocation3], 128  }
  0x13   :  { %1222 = vsyncadd [#allocation3], 4294967168 }
  0x14   :  { %1223 = dma.done.wait [#allocation6], 16896  }
  0x15   :  { %1224 = vsyncadd [#allocation6], 4294950400 }
  0x16   :  { %1225 = dma.done.wait [#allocation9], 8320  }
  0x17   :  { %1226 = vsyncadd [#allocation9], 4294958976  ;;  %v98_v0 = vld [vmem:[#allocation5] sm:$0xff]  ;;  %v106_v1 = vld [vmem:[#allocation8 + $0x38] sm:$0xff]  ;;  %s1240_s20 = smov 64   ;;  %vm107_vm0 = vcmask 523264  }
  0x18   :  { %v139_v2 = vld [vmem:[#allocation8 + $0x78] sm:$0xff]  ;;  %141 = vrot.lane.b32.xlu0 %v98_v0, %s1240_s20  ;;  %119 = vmatpush.msra.mxu2 %v106_v1  ;;  %v105_v3 = vld [vmem:[#allocation8 + $0x30] sm:$0xff]  ;;  %v104_v5 = vld [vmem:[#allocation8 + $0x28] sm:$0xff]  ;;  %s1241_s4 = smov [#allocation11]   ;;  %s985_s24 = sshll.u32 %s1403_s5, 4  ;;  %s986_s24 = int_to_ptr.hbm [resolvable:$true] %s985_s24 }
  0x19   :  { %v138_v4 = vld [vmem:[#allocation8 + $0x70] sm:$0xff]  ;;  %153 = vmatpush.msra.mxu3 %v139_v2  ;;  %v137_v6 = vld [vmem:[#allocation8 + $0x68] sm:$0xff]  ;;  %v103_v7 = vld [vmem:[#allocation8 + $0x20] sm:$0xff]  ;;  %s983_s21 = sshll.u32 %s1241_s4, 4  ;;  %s984_s21 = int_to_ptr.vmem [resolvable:$true] %s983_s21 }
  0x1a   :  { %120 = vmatpush.msra.mxu2 %v105_v3  ;;  %v136_v8 = vld [vmem:[#allocation8 + $0x60] sm:$0xff]  ;;  %v102_v9 = vld [vmem:[#allocation8 + $0x18] sm:$0xff]  ;;  %v101_v11 = vld [vmem:[#allocation8 + $0x10] sm:$0xff] }
  0x1b   :  { %154 = vmatpush.msra.mxu3 %v138_v4  ;;  %v135_v10 = vld [vmem:[#allocation8 + $0x58] sm:$0xff]  ;;  %v134_v12 = vld [vmem:[#allocation8 + $0x50] sm:$0xff]  ;;  %v100_v13 = vld [vmem:[#allocation8 + $0x8] sm:$0xff] }
  0x1c   :  { %121 = vmatpush.msra.mxu2 %v104_v5  ;;  %v133_v14 = vld [vmem:[#allocation8 + $0x48] sm:$0xff]  ;;  %v99_v15 = vld [vmem:[#allocation8] sm:$0xff]  ;;  %v1294_v17 = vld [vmem:[#allocation2] sm:$0xff] }
  0x1d   :  { %155 = vmatpush.msra.mxu3 %v137_v6  ;;  %v132_v16 = vld [vmem:[#allocation8 + $0x40] sm:$0xff]  ;;  %v201_v19 = vld [vmem:[#allocation7 + $0xf0] sm:$0xff]  ;;  %v202_v20 = vld [vmem:[#allocation7 + $0xf8] sm:$0xff] }
  0x1e   :  { %122 = vmatpush.msra.mxu2 %v103_v7  ;;  %v199_v21 = vld [vmem:[#allocation7 + $0xe0] sm:$0xff]  ;;  %v200_v22 = vld [vmem:[#allocation7 + $0xe8] sm:$0xff]  ;;  %v197_v23 = vld [vmem:[#allocation7 + $0xd0] sm:$0xff] }
  0x1f   :  { %156 = vmatpush.msra.mxu3 %v136_v8  ;;  %v198_v24 = vld [vmem:[#allocation7 + $0xd8] sm:$0xff]  ;;  %v195_v25 = vld [vmem:[#allocation7 + $0xc0] sm:$0xff]  ;;  %v196_v26 = vld [vmem:[#allocation7 + $0xc8] sm:$0xff] }
  0x20   :  { %123 = vmatpush.msra.mxu2 %v102_v9  ;;  %v193_v27 = vld [vmem:[#allocation7 + $0xb0] sm:$0xff]  ;;  %v194_v28 = vld [vmem:[#allocation7 + $0xb8] sm:$0xff]  ;;  %v191_v29 = vld [vmem:[#allocation7 + $0xa0] sm:$0xff] }
  0x21   :  { %157 = vmatpush.msra.mxu3 %v135_v10  ;;  %v192_v30 = vld [vmem:[#allocation7 + $0xa8] sm:$0xff]  ;;  %v189_v31 = vld [vmem:[#allocation7 + $0x90] sm:$0xff]  ;;  %v190_v32 = vld [vmem:[#allocation7 + $0x98] sm:$0xff] }
  0x22   :  { %124 = vmatpush.msra.mxu2 %v101_v11  ;;  %v187_v33 = vld [vmem:[#allocation7 + $0x80] sm:$0xff]  ;;  %v188_v34 = vld [vmem:[#allocation7 + $0x88] sm:$0xff]  ;;  %v185_v35 = vld [vmem:[#allocation7 + $0x70] sm:$0xff] }
  0x23   :  { %158 = vmatpush.msra.mxu3 %v134_v12  ;;  %v186_v36 = vld [vmem:[#allocation7 + $0x78] sm:$0xff]  ;;  %v183_v37 = vld [vmem:[#allocation7 + $0x60] sm:$0xff]  ;;  %v184_v38 = vld [vmem:[#allocation7 + $0x68] sm:$0xff] }
  0x24   :  { %125 = vmatpush.msra.mxu2 %v100_v13  ;;  %v181_v39 = vld [vmem:[#allocation7 + $0x50] sm:$0xff]  ;;  %v182_v40 = vld [vmem:[#allocation7 + $0x58] sm:$0xff]  ;;  %v179_v41 = vld [vmem:[#allocation7 + $0x40] sm:$0xff] }
  0x25   :  { %159 = vmatpush.msra.mxu3 %v133_v14  ;;  %v180_v42 = vld [vmem:[#allocation7 + $0x48] sm:$0xff]  ;;  %v177_v43 = vld [vmem:[#allocation7 + $0x30] sm:$0xff]  ;;  %v178_v44 = vld [vmem:[#allocation7 + $0x38] sm:$0xff] }
  0x26   :  { %126 = vmatpush.msra.mxu2 %v99_v15  ;;  %v175_v45 = vld [vmem:[#allocation7 + $0x20] sm:$0xff]  ;;  %v176_v46 = vld [vmem:[#allocation7 + $0x28] sm:$0xff]  ;;  %v173_v47 = vld [vmem:[#allocation7 + $0x10] sm:$0xff] }
  0x27   :  { %160 = vmatpush.msra.mxu3 %v132_v16  ;;  %1000 = vmatmul.msk.f32.vlgmr.msra.gmra.mxu2 %vm107_vm0, %v1294_v17  ;;  %v174_v48 = vld [vmem:[#allocation7 + $0x18] sm:$0xff]  ;;  %v171_v52 = vld [vmem:[#allocation7] sm:$0xff]  ;;  %v172_v53 = vld [vmem:[#allocation7 + $0x8] sm:$0xff] }
  0x28   :  { %209 = vmatpush.msrb.mxu2 %v201_v19  ;;  %v203_v56 = vld [vmem:[#allocation10] sm:$0x3]  ;;  %v326_v15 = vld [vmem:[#allocation8 + $0xb8] sm:$0xff]  ;;  %v325_v16 = vld [vmem:[#allocation8 + $0xb0] sm:$0xff] }
  0x29   :  { %229 = vmatpush.msrb.mxu3 %v202_v20  ;;  %v206_v57 = vperm.slane %v203_v56, 1  ;;  %v205_v61 = vperm.slane %v203_v56, 0  ;;  %337 = vmatpush.msra.mxu0 %v326_v15  ;;  %v324_v19 = vld [vmem:[#allocation8 + $0xa8] sm:$0xff]  ;;  %v356_v20 = vld [vmem:[#allocation8 + $0xf0] sm:$0xff] }
  0x2a   :  { %210 = vmatpush.msrb.mxu2 %v199_v21  ;;  %v355_v21 = vld [vmem:[#allocation8 + $0xe8] sm:$0xff]  ;;  %v416_v56 = vld [vmem:[#allocation7 + $0x1d0] sm:$0xff] }
  0x2b   :  { %230 = vmatpush.msrb.mxu3 %v200_v22  ;;  %338 = vmatpush.msra.mxu0 %v325_v16  ;;  %v323_v22 = vld [vmem:[#allocation8 + $0xa0] sm:$0xff]  ;;  %v395_v15 = vld [vmem:[#allocation7 + $0x128] sm:$0xff]  ;;  %v392_v16 = vld [vmem:[#allocation7 + $0x110] sm:$0xff] }
  0x2c   :  { %211 = vmatpush.msrb.mxu2 %v197_v23  ;;  %v354_v23 = vld [vmem:[#allocation8 + $0xe0] sm:$0xff] }
  0x2d   :  { %231 = vmatpush.msrb.mxu3 %v198_v24  ;;  %339 = vmatpush.msra.mxu0 %v324_v19  ;;  %v322_v24 = vld [vmem:[#allocation8 + $0x98] sm:$0xff] }
  0x2e   :  { %212 = vmatpush.msrb.mxu2 %v195_v25  ;;  %v321_v25 = vld [vmem:[#allocation8 + $0x90] sm:$0xff] }
  0x2f   :  { %232 = vmatpush.msrb.mxu3 %v196_v26  ;;  %340 = vmatpush.msra.mxu0 %v323_v22  ;;  %v320_v26 = vld [vmem:[#allocation8 + $0x88] sm:$0xff]  ;;  %v390_v22 = vld [vmem:[#allocation7 + $0x100] sm:$0xff] }
  0x30   :  { %213 = vmatpush.msrb.mxu2 %v193_v27 }
  0x31   :  { %233 = vmatpush.msrb.mxu3 %v194_v28  ;;  %341 = vmatpush.msra.mxu0 %v322_v24 }
  0x32   :  { %214 = vmatpush.msrb.mxu2 %v191_v29 }
  0x33   :  { %234 = vmatpush.msrb.mxu3 %v192_v30  ;;  %342 = vmatpush.msra.mxu0 %v321_v25 }
  0x34   :  { %215 = vmatpush.msrb.mxu2 %v189_v31  ;;  %v317_v31 = vld [vmem:[#allocation5 + $0x8] sm:$0xff] }
  0x35   :  { %235 = vmatpush.msrb.mxu3 %v190_v32  ;;  %343 = vmatpush.msra.mxu0 %v320_v26  ;;  %v423_v26 = vld [vmem:[#allocation10 + $0x2] sm:$0x3] }
  0x36   :  { %216 = vmatpush.msrb.mxu2 %v187_v33 }
  0x37   :  { %236 = vmatpush.msrb.mxu3 %v188_v34 }
  0x38   :  { %217 = vmatpush.msrb.mxu2 %v185_v35  ;;  %v319_v35 = vld [vmem:[#allocation8 + $0x80] sm:$0xff] }
  0x39   :  { %237 = vmatpush.msrb.mxu3 %v186_v36  ;;  %v353_v36 = vld [vmem:[#allocation8 + $0xd8] sm:$0xff]  ;;  %344 = vmatpush.msra.mxu0 %v319_v35 }
  0x3a   :  { %218 = vmatpush.msrb.mxu2 %v183_v37  ;;  %v351_v37 = vld [vmem:[#allocation8 + $0xc8] sm:$0xff] }
  0x3b   :  { %238 = vmatpush.msrb.mxu3 %v184_v38  ;;  %v350_v38 = vld [vmem:[#allocation8 + $0xc0] sm:$0xff] }
  0x3c   :  { %219 = vmatpush.msrb.mxu2 %v181_v39 }
  0x3d   :  { %239 = vmatpush.msrb.mxu3 %v182_v40 }
  0x3e   :  { %220 = vmatpush.msrb.mxu2 %v179_v41 }
  0x3f   :  { %240 = vmatpush.msrb.mxu3 %v180_v42 }
  0x40   :  { %221 = vmatpush.msrb.mxu2 %v177_v43 }
  0x41   :  { %241 = vmatpush.msrb.mxu3 %v178_v44 }
  0x42   :  { %222 = vmatpush.msrb.mxu2 %v175_v45 }
  0x43   :  { %242 = vmatpush.msrb.mxu3 %v176_v46 }
  0x44   :  { %223 = vmatpush.msrb.mxu2 %v173_v47 }
  0x45   :  { %243 = vmatpush.msrb.mxu3 %v174_v48 }
  0x46   :  { %224 = vmatpush.msrb.mxu2 %v171_v52  ;;  %v420_v52 = vld [vmem:[#allocation7 + $0x1f0] sm:$0xff] }
  0x47   :  { %244 = vmatpush.msrb.mxu3 %v172_v53  ;;  %v421_v53 = vld [vmem:[#allocation7 + $0x1f8] sm:$0xff]  ;;  %429 = vmatpush.msrb.mxu0 %v420_v52 }
  0x48   :  { %v547_v52 = vld [vmem:[#allocation8 + $0x138] sm:$0xff] }
  0x49   :  { %558 = vmatpush.msra.mxu2 %v547_v52  ;;  %v615_v52 = vld [vmem:[#allocation7 + $0x220] sm:$0xff] }
  0x8a   :  { %v1298_v18 = vpop.permute.xlu0 %141 }
  0x8b   :  { %1001 = vmatmul.msk.f32.vlgmr.msra.gmra.mxu3 %vm107_vm0, %v1298_v18 }
  0xaa   :  { %v128_v49 = vpop.f32.mrf.mxu2 }
 0x10e   :  { %v162_v50 = vpop.f32.mrf.mxu3 }
 0x10f   :  { %v165_v51 = vmul.f32 %v162_v50, %v128_v49 }
 0x111   :  { %167 = vrot.lane.b32.xlu0 %v165_v51, %s1240_s20 }
 0x183   :  { %v168_v54 = vpop.permute.xlu0 %167 }
 0x184   :  { %v170_v55 = vsel %vm107_vm0, %v1294_v17, %v168_v54  ;;  %v357_v17 = vld [vmem:[#allocation8 + $0xf8] sm:$0xff]  ;;  %v418_v54 = vld [vmem:[#allocation7 + $0x1e0] sm:$0xff] }
 0x185   :  { %225 = vmatmul.f32.vlgmr.msrb.gmra.mxu2 %v170_v55  ;;  %245 = vmatmul.f32.vlgmr.msrb.gmra.mxu3 %v170_v55  ;;  %v419_v55 = vld [vmem:[#allocation7 + $0x1e8] sm:$0xff] }
 0x186   :  { %371 = vmatpush.msra.mxu1 %v357_v17  ;;  %430 = vmatpush.msrb.mxu0 %v418_v54  ;;  %v393_v17 = vld [vmem:[#allocation7 + $0x118] sm:$0xff]  ;;  %v546_v54 = vld [vmem:[#allocation8 + $0x130] sm:$0xff] }
 0x187   :  { %559 = vmatpush.msra.mxu2 %v546_v54  ;;  %v613_v54 = vld [vmem:[#allocation7 + $0x210] sm:$0xff] }
 0x188   :  { %372 = vmatpush.msra.mxu1 %v356_v20  ;;  %431 = vmatpush.msrb.mxu0 %v416_v56  ;;  %v545_v56 = vld [vmem:[#allocation8 + $0x128] sm:$0xff] }
 0x189   :  { %560 = vmatpush.msra.mxu2 %v545_v56 }
 0x18a   :  { %373 = vmatpush.msra.mxu1 %v355_v21 }
 0x18c   :  { %374 = vmatpush.msra.mxu1 %v354_v23  ;;  %v391_v23 = vld [vmem:[#allocation7 + $0x108] sm:$0xff] }
 0x18e   :  { %375 = vmatpush.msra.mxu1 %v353_v36 }
 0x208   :  { %v246_v58 = vpop.f32.mrf.mxu3  ;;  %v226_v62 = vpop.f32.mrf.mxu2 }
 0x209   :  { %v247_v59 = vadd.f32 %v246_v58, %v206_v57  ;;  %v227_v63 = vadd.f32 %v226_v62, %v205_v61  ;;  %v417_v57 = vld [vmem:[#allocation7 + $0x1d8] sm:$0xff]  ;;  %v414_v58 = vld [vmem:[#allocation7 + $0x1c0] sm:$0xff] }
 0x20a   :  { %v413_v61 = vld [vmem:[#allocation7 + $0x1b8] sm:$0xff]  ;;  %432 = vmatpush.msrb.mxu0 %v414_v58  ;;  %v410_v62 = vld [vmem:[#allocation7 + $0x1a0] sm:$0xff] }
 0x20b   :  { %1029 = vtanh.f32 %v247_v59  ;;  %v1002_v0 = vmul.f32 -1.442695, %v227_v63  ;;  %v1003_v32 = vmul.f32 -1.442695, %v247_v59  ;;  %v415_v59 = vld [vmem:[#allocation7 + $0x1c8] sm:$0xff]  ;;  %v544_v58 = vld [vmem:[#allocation8 + $0x120] sm:$0xff] }
 0x20c   :  { %v411_v63 = vld [vmem:[#allocation7 + $0x1a8] sm:$0xff]  ;;  %561 = vmatpush.msra.mxu2 %v544_v58 }
 0x20d   :  { %1031 = vpow2.f32 %v1002_v0  ;;  %v408_v0 = vld [vmem:[#allocation7 + $0x190] sm:$0xff] }
 0x211   :  { %v1030_v60 = vpop.eup %1029 }
 0x212   :  { %291 = vrot.lane.b32.xlu1 %v1030_v60, %s1240_s20  ;;  %v412_v60 = vld [vmem:[#allocation7 + $0x1b0] sm:$0xff] }
 0x213   :  { %v1032_v1 = vpop.eup %1031  ;;  %433 = vmatpush.msrb.mxu0 %v412_v60  ;;  %v543_v60 = vld [vmem:[#allocation8 + $0x118] sm:$0xff] }
 0x214   :  { %v255_v2 = vadd.f32 1.0, %v1032_v1  ;;  %v409_v1 = vld [vmem:[#allocation7 + $0x198] sm:$0xff]  ;;  %562 = vmatpush.msra.mxu2 %v543_v60  ;;  %v612_v60 = vld [vmem:[#allocation7 + $0x208] sm:$0xff] }
 0x215   :  { %434 = vmatpush.msrb.mxu0 %v410_v62  ;;  %v542_v62 = vld [vmem:[#allocation8 + $0x110] sm:$0xff] }
 0x216   :  { %1033 = vrcp.f32 %v255_v2  ;;  %v268_v8 = vand.u32 2147483648, %v255_v2  ;;  %vm262_vm2 = vweird.f32 %v255_v2  ;;  %v266_v9 = vand.u32 2147483647, %v255_v2  ;;  %563 = vmatpush.msra.mxu2 %v542_v62 }
 0x217   :  { %435 = vmatpush.msrb.mxu0 %v408_v0  ;;  %v541_v0 = vld [vmem:[#allocation8 + $0x108] sm:$0xff] }
 0x218   :  { %v269_v11 = vor.u32 1.1754944e-38, %v268_v8  ;;  %vm267_vm4 = vcmp.eq.f32.partialorder %v266_v9, 8.507059e+37  ;;  %v400_v8 = vld [vmem:[#allocation7 + $0x150] sm:$0xff]  ;;  %v401_v9 = vld [vmem:[#allocation7 + $0x158] sm:$0xff]  ;;  %564 = vmatpush.msra.mxu2 %v541_v0 }
 0x21c   :  { %v1034_v3 = vpop.eup %1033 }
 0x21d   :  { %v258_v4 = vmul.f32 %v1034_v3, %v255_v2  ;;  %vm263_vm1 = vweird.f32 %v1034_v3  ;;  %v406_v2 = vld [vmem:[#allocation7 + $0x180] sm:$0xff] }
 0x21e   :  { %vm264_vm3 = vmor %vm262_vm2, %vm263_vm1  ;;  %436 = vmatpush.msrb.mxu0 %v406_v2 }
 0x21f   :  { %v259_v5 = vsub.f32 1.0, %v258_v4  ;;  %v404_v4 = vld [vmem:[#allocation7 + $0x170] sm:$0xff] }
 0x220   :  { %437 = vmatpush.msrb.mxu0 %v404_v4 }
 0x221   :  { %v260_v6 = vmul.f32 %v1034_v3, %v259_v5  ;;  %v405_v5 = vld [vmem:[#allocation7 + $0x178] sm:$0xff] }
 0x223   :  { %v261_v7 = vadd.f32 %v1034_v3, %v260_v6  ;;  %v402_v6 = vld [vmem:[#allocation7 + $0x160] sm:$0xff] }
 0x224   :  { %438 = vmatpush.msrb.mxu0 %v402_v6 }
 0x225   :  { %v265_v10 = vsel %vm264_vm3, %v1034_v3, %v261_v7  ;;  %v407_v3 = vld [vmem:[#allocation7 + $0x188] sm:$0xff] }
 0x226   :  { %v270_v13 = vsel %vm267_vm4, %v269_v11, %v265_v10  ;;  %v403_v7 = vld [vmem:[#allocation7 + $0x168] sm:$0xff]  ;;  %v398_v10 = vld [vmem:[#allocation7 + $0x140] sm:$0xff]  ;;  %439 = vmatpush.msrb.mxu0 %v400_v8 }
 0x227   :  { %v289_v27 = vmul.f32 %v270_v13, %v1298_v18  ;;  %v352_v18 = vld [vmem:[#allocation8 + $0xd0] sm:$0xff]  ;;  %v399_v11 = vld [vmem:[#allocation7 + $0x148] sm:$0xff] }
 0x228   :  { %376 = vmatpush.msra.mxu1 %v352_v18  ;;  %440 = vmatpush.msrb.mxu0 %v398_v10  ;;  %v571_v10 = vld [vmem:[#allocation8 + $0x140] sm:$0xff] }
 0x22a   :  { %377 = vmatpush.msra.mxu1 %v351_v37 }
 0x22c   :  { %378 = vmatpush.msra.mxu1 %v350_v38 }
 0x22e   :  { %449 = vmatpush.msrb.mxu1 %v421_v53  ;;  %v578_v53 = vld [vmem:[#allocation8 + $0x178] sm:$0xff] }
 0x22f   :  { %592 = vmatpush.msra.mxu3 %v578_v53  ;;  %v616_v53 = vld [vmem:[#allocation7 + $0x228] sm:$0xff] }
 0x230   :  { %450 = vmatpush.msrb.mxu1 %v419_v55  ;;  %v577_v55 = vld [vmem:[#allocation8 + $0x170] sm:$0xff] }
 0x231   :  { %593 = vmatpush.msra.mxu3 %v577_v55  ;;  %v614_v55 = vld [vmem:[#allocation7 + $0x218] sm:$0xff] }
 0x232   :  { %451 = vmatpush.msrb.mxu1 %v417_v57  ;;  %v576_v57 = vld [vmem:[#allocation8 + $0x168] sm:$0xff] }
 0x233   :  { %594 = vmatpush.msra.mxu3 %v576_v57 }
 0x234   :  { %452 = vmatpush.msrb.mxu1 %v415_v59  ;;  %v575_v59 = vld [vmem:[#allocation8 + $0x160] sm:$0xff] }
 0x235   :  { %595 = vmatpush.msra.mxu3 %v575_v59  ;;  %v611_v59 = vld [vmem:[#allocation7 + $0x200] sm:$0xff] }
 0x236   :  { %453 = vmatpush.msrb.mxu1 %v413_v61  ;;  %v574_v61 = vld [vmem:[#allocation8 + $0x158] sm:$0xff] }
 0x237   :  { %596 = vmatpush.msra.mxu3 %v574_v61 }
 0x238   :  { %454 = vmatpush.msrb.mxu1 %v411_v63  ;;  %v573_v63 = vld [vmem:[#allocation8 + $0x150] sm:$0xff] }
 0x239   :  { %597 = vmatpush.msra.mxu3 %v573_v63  ;;  %v644_v63 = vld [vmem:[#allocation10 + $0x4] sm:$0x3] }
 0x23a   :  { %455 = vmatpush.msrb.mxu1 %v409_v1  ;;  %v572_v1 = vld [vmem:[#allocation8 + $0x148] sm:$0xff]  ;;  %v647_v0 = vperm.slane %v644_v63, 1 }
 0x23b   :  { %598 = vmatpush.msra.mxu3 %v572_v1 }
 0x23c   :  { %456 = vmatpush.msrb.mxu1 %v407_v3 }
 0x23d   :  { %599 = vmatpush.msra.mxu3 %v571_v10 }
 0x23e   :  { %457 = vmatpush.msrb.mxu1 %v405_v5 }
 0x240   :  { %458 = vmatpush.msrb.mxu1 %v403_v7 }
 0x242   :  { %459 = vmatpush.msrb.mxu1 %v401_v9  ;;  %v540_v9 = vld [vmem:[#allocation8 + $0x100] sm:$0xff] }
 0x243   :  { %565 = vmatpush.msra.mxu2 %v540_v9 }
 0x244   :  { %460 = vmatpush.msrb.mxu1 %v399_v11 }
 0x284   :  { %v292_v12 = vpop.permute.xlu1 %291 }
 0x285   :  { %v294_v14 = vmul.f32 %v292_v12, %v270_v13  ;;  %v396_v12 = vld [vmem:[#allocation7 + $0x130] sm:$0xff]  ;;  %v397_v13 = vld [vmem:[#allocation7 + $0x138] sm:$0xff] }
 0x286   :  { %441 = vmatpush.msrb.mxu0 %v396_v12  ;;  %461 = vmatpush.msrb.mxu1 %v397_v13 }
 0x287   :  { %296 = vrot.lane.b32.xlu1 %v294_v14, %s1240_s20  ;;  %v394_v14 = vld [vmem:[#allocation7 + $0x120] sm:$0xff] }
 0x288   :  { %442 = vmatpush.msrb.mxu0 %v394_v14  ;;  %462 = vmatpush.msrb.mxu1 %v395_v15 }
 0x28a   :  { %443 = vmatpush.msrb.mxu0 %v392_v16  ;;  %463 = vmatpush.msrb.mxu1 %v393_v17 }
 0x28c   :  { %444 = vmatpush.msrb.mxu0 %v390_v22  ;;  %464 = vmatpush.msrb.mxu1 %v391_v23 }
 0x2f9   :  { %v297_v28 = vpop.permute.xlu1 %296 }
 0x2fa   :  { %v1308_v29 = vadd.f32 %v297_v28, %v289_v27  ;;  %v426_v27 = vperm.slane %v423_v26, 1 }
 0x2fc   :  { %1035 = vtanh.f32 %v1308_v29 }
 0x2fd   :  { %1037 = vpow2.f32 %v1003_v32  ;;  %v425_v32 = vperm.slane %v423_v26, 0  ;;  %v639_v26 = vld [vmem:[#allocation7 + $0x2e0] sm:$0xff] }
 0x302   :  { %v1036_v30 = vpop.eup %1035 }
 0x303   :  { %302 = vrot.lane.b32.xlu2 %v1036_v30, %s1240_s20  ;;  %v1038_v33 = vpop.eup %1037 }
 0x304   :  { %v256_v34 = vadd.f32 1.0, %v1038_v33 }
 0x306   :  { %1039 = vrcp.f32 %v256_v34  ;;  %v283_v44 = vand.u32 2147483648, %v256_v34  ;;  %vm277_vm6 = vweird.f32 %v256_v34  ;;  %v281_v45 = vand.u32 2147483647, %v256_v34 }
 0x308   :  { %v284_v47 = vor.u32 1.1754944e-38, %v283_v44  ;;  %vm282_vm8 = vcmp.eq.f32.partialorder %v281_v45, 8.507059e+37 }
 0x30b   :  { %359 = vrot.lane.b32.xlu2 %v317_v31, %s1240_s20 }
 0x30c   :  { %v1040_v39 = vpop.eup %1039 }
 0x30d   :  { %v273_v40 = vmul.f32 %v1040_v39, %v256_v34  ;;  %vm278_vm5 = vweird.f32 %v1040_v39 }
 0x30e   :  { %vm279_vm7 = vmor %vm277_vm6, %vm278_vm5 }
 0x30f   :  { %v274_v41 = vsub.f32 1.0, %v273_v40 }
 0x311   :  { %v275_v42 = vmul.f32 %v1040_v39, %v274_v41 }
 0x313   :  { %v276_v43 = vadd.f32 %v1040_v39, %v275_v42 }
 0x315   :  { %v280_v46 = vsel %vm279_vm7, %v1040_v39, %v276_v43 }
 0x316   :  { %v285_v48 = vsel %vm282_vm8, %v284_v47, %v280_v46 }
 0x35d   :  { %v303_v49 = vpop.permute.xlu2 %302 }
 0x35e   :  { %v1313_v50 = vmul.f32 %v303_v49, %v285_v48  ;;  %v538_v49 = vld [vmem:[#allocation5 + $0x10] sm:$0xff] }
 0x360   :  { %1004 = vmatmul.msk.f32.vlgmr.msra.gmra.mxu0 %vm107_vm0, %v1313_v50 }
 0x365   :  { %v1317_v51 = vpop.permute.xlu2 %359 }
 0x366   :  { %1005 = vmatmul.msk.f32.vlgmr.msra.gmra.mxu1 %vm107_vm0, %v1317_v51 }
 0x3dd   :  { %v346_v19 = vpop.f32.mrf.mxu0 }
 0x3e3   :  { %v380_v20 = vpop.f32.mrf.mxu1 }
 0x3e4   :  { %v383_v21 = vmul.f32 %v380_v20, %v346_v19 }
 0x3e6   :  { %385 = vrot.lane.b32.xlu0 %v383_v21, %s1240_s20 }
 0x458   :  { %v386_v24 = vpop.permute.xlu0 %385 }
 0x459   :  { %v388_v25 = vsel %vm107_vm0, %v1313_v50, %v386_v24  ;;  %v641_v24 = vld [vmem:[#allocation7 + $0x2f0] sm:$0xff] }
 0x45a   :  { %445 = vmatmul.f32.vlgmr.msrb.gmra.mxu0 %v388_v25  ;;  %465 = vmatmul.f32.vlgmr.msrb.gmra.mxu1 %v388_v25  ;;  %v642_v25 = vld [vmem:[#allocation7 + $0x2f8] sm:$0xff] }
 0x45b   :  { %650 = vmatpush.msrb.mxu2 %v641_v24  ;;  %670 = vmatpush.msrb.mxu3 %v642_v25 }
 0x45d   :  { %651 = vmatpush.msrb.mxu2 %v639_v26  ;;  %v768_v26 = vld [vmem:[#allocation8 + $0x1b8] sm:$0xff] }
 0x45e   :  { %779 = vmatpush.msra.mxu0 %v768_v26  ;;  %v838_v26 = vld [vmem:[#allocation7 + $0x330] sm:$0xff] }
 0x4d7   :  { %v466_v28 = vpop.f32.mrf.mxu1  ;;  %v446_v33 = vpop.f32.mrf.mxu0 }
 0x4d8   :  { %v1324_v30 = vadd.f32 %v466_v28, %v426_v27  ;;  %v447_v34 = vadd.f32 %v446_v33, %v425_v32  ;;  %v640_v27 = vld [vmem:[#allocation7 + $0x2e8] sm:$0xff]  ;;  %v637_v28 = vld [vmem:[#allocation7 + $0x2d0] sm:$0xff] }
 0x4d9   :  { %671 = vmatpush.msrb.mxu3 %v640_v27  ;;  %v636_v32 = vld [vmem:[#allocation7 + $0x2c8] sm:$0xff]  ;;  %652 = vmatpush.msrb.mxu2 %v637_v28  ;;  %v633_v33 = vld [vmem:[#allocation7 + $0x2b0] sm:$0xff]  ;;  %v799_v27 = vld [vmem:[#allocation8 + $0x1f8] sm:$0xff] }
 0x4da   :  { %1041 = vtanh.f32 %v1324_v30  ;;  %v1006_v35 = vmul.f32 -1.442695, %v447_v34  ;;  %v1007_v6 = vmul.f32 -1.442695, %v1324_v30  ;;  %v638_v30 = vld [vmem:[#allocation7 + $0x2d8] sm:$0xff]  ;;  %v767_v28 = vld [vmem:[#allocation8 + $0x1b0] sm:$0xff]  ;;  %813 = vmatpush.msra.mxu1 %v799_v27 }
 0x4db   :  { %672 = vmatpush.msrb.mxu3 %v638_v30  ;;  %v634_v34 = vld [vmem:[#allocation7 + $0x2b8] sm:$0xff]  ;;  %v798_v30 = vld [vmem:[#allocation8 + $0x1f0] sm:$0xff]  ;;  %780 = vmatpush.msra.mxu0 %v767_v28  ;;  %v836_v28 = vld [vmem:[#allocation7 + $0x320] sm:$0xff] }
 0x4dc   :  { %1043 = vpow2.f32 %v1006_v35  ;;  %v631_v35 = vld [vmem:[#allocation7 + $0x2a0] sm:$0xff]  ;;  %814 = vmatpush.msra.mxu1 %v798_v30  ;;  %v839_v27 = vld [vmem:[#allocation7 + $0x338] sm:$0xff]  ;;  %v837_v30 = vld [vmem:[#allocation7 + $0x328] sm:$0xff] }
 0x4dd   :  { %673 = vmatpush.msrb.mxu3 %v636_v32  ;;  %v797_v32 = vld [vmem:[#allocation8 + $0x1e8] sm:$0xff] }
 0x4de   :  { %815 = vmatpush.msra.mxu1 %v797_v32  ;;  %v835_v32 = vld [vmem:[#allocation7 + $0x318] sm:$0xff] }
 0x4df   :  { %674 = vmatpush.msrb.mxu3 %v634_v34  ;;  %v796_v34 = vld [vmem:[#allocation8 + $0x1e0] sm:$0xff] }
 0x4e0   :  { %v1042_v31 = vpop.eup %1041  ;;  %816 = vmatpush.msra.mxu1 %v796_v34 }
 0x4e1   :  { %511 = vrot.lane.b32.xlu1 %v1042_v31, %s1240_s20  ;;  %v635_v31 = vld [vmem:[#allocation7 + $0x2c0] sm:$0xff] }
 0x4e2   :  { %v1044_v36 = vpop.eup %1043  ;;  %653 = vmatpush.msrb.mxu2 %v635_v31  ;;  %v766_v31 = vld [vmem:[#allocation8 + $0x1a8] sm:$0xff] }
 0x4e3   :  { %v475_v18 = vadd.f32 1.0, %v1044_v36  ;;  %v632_v36 = vld [vmem:[#allocation7 + $0x2a8] sm:$0xff]  ;;  %781 = vmatpush.msra.mxu0 %v766_v31  ;;  %v834_v31 = vld [vmem:[#allocation7 + $0x310] sm:$0xff] }
 0x4e4   :  { %654 = vmatpush.msrb.mxu2 %v633_v33  ;;  %675 = vmatpush.msrb.mxu3 %v632_v36  ;;  %v765_v33 = vld [vmem:[#allocation8 + $0x1a0] sm:$0xff]  ;;  %v795_v36 = vld [vmem:[#allocation8 + $0x1d8] sm:$0xff] }
 0x4e5   :  { %1045 = vrcp.f32 %v475_v18  ;;  %v488_v42 = vand.u32 2147483648, %v475_v18  ;;  %vm482_vm10 = vweird.f32 %v475_v18  ;;  %v486_v43 = vand.u32 2147483647, %v475_v18  ;;  %782 = vmatpush.msra.mxu0 %v765_v33  ;;  %817 = vmatpush.msra.mxu1 %v795_v36  ;;  %v832_v36 = vld [vmem:[#allocation7 + $0x300] sm:$0xff] }
 0x4e6   :  { %655 = vmatpush.msrb.mxu2 %v631_v35  ;;  %v764_v35 = vld [vmem:[#allocation8 + $0x198] sm:$0xff] }
 0x4e7   :  { %v489_v45 = vor.u32 1.1754944e-38, %v488_v42  ;;  %vm487_vm12 = vcmp.eq.f32.partialorder %v486_v43, 8.507059e+37  ;;  %v623_v42 = vld [vmem:[#allocation7 + $0x260] sm:$0xff]  ;;  %v624_v43 = vld [vmem:[#allocation7 + $0x268] sm:$0xff]  ;;  %783 = vmatpush.msra.mxu0 %v764_v35 }
 0x4e9   :  { %580 = vrot.lane.b32.xlu1 %v538_v49, %s1240_s20  ;;  %v618_v49 = vld [vmem:[#allocation7 + $0x238] sm:$0xff] }
 0x4eb   :  { %v1046_v37 = vpop.eup %1045 }
 0x4ec   :  { %v478_v38 = vmul.f32 %v1046_v37, %v475_v18  ;;  %vm483_vm9 = vweird.f32 %v1046_v37  ;;  %v629_v18 = vld [vmem:[#allocation7 + $0x290] sm:$0xff] }
 0x4ed   :  { %vm484_vm11 = vmor %vm482_vm10, %vm483_vm9  ;;  %656 = vmatpush.msrb.mxu2 %v629_v18  ;;  %v763_v18 = vld [vmem:[#allocation8 + $0x190] sm:$0xff] }
 0x4ee   :  { %v479_v39 = vsub.f32 1.0, %v478_v38  ;;  %v627_v38 = vld [vmem:[#allocation7 + $0x280] sm:$0xff]  ;;  %784 = vmatpush.msra.mxu0 %v763_v18  ;;  %v833_v18 = vld [vmem:[#allocation7 + $0x308] sm:$0xff] }
 0x4ef   :  { %657 = vmatpush.msrb.mxu2 %v627_v38  ;;  %v762_v38 = vld [vmem:[#allocation8 + $0x188] sm:$0xff] }
 0x4f0   :  { %v480_v40 = vmul.f32 %v1046_v37, %v479_v39  ;;  %v628_v39 = vld [vmem:[#allocation7 + $0x288] sm:$0xff]  ;;  %785 = vmatpush.msra.mxu0 %v762_v38 }
 0x4f2   :  { %v481_v41 = vadd.f32 %v1046_v37, %v480_v40  ;;  %v625_v40 = vld [vmem:[#allocation7 + $0x270] sm:$0xff] }
 0x4f3   :  { %658 = vmatpush.msrb.mxu2 %v625_v40 }
 0x4f4   :  { %v485_v44 = vsel %vm484_vm11, %v1046_v37, %v481_v41  ;;  %v630_v37 = vld [vmem:[#allocation7 + $0x298] sm:$0xff] }
 0x4f5   :  { %v490_v47 = vsel %vm487_vm12, %v489_v45, %v485_v44  ;;  %676 = vmatpush.msrb.mxu3 %v630_v37  ;;  %v626_v41 = vld [vmem:[#allocation7 + $0x278] sm:$0xff]  ;;  %v621_v44 = vld [vmem:[#allocation7 + $0x250] sm:$0xff]  ;;  %659 = vmatpush.msrb.mxu2 %v623_v42 }
 0x4f6   :  { %v509_v2 = vmul.f32 %v490_v47, %v1317_v51  ;;  %v622_v45 = vld [vmem:[#allocation7 + $0x258] sm:$0xff]  ;;  %v794_v37 = vld [vmem:[#allocation8 + $0x1d0] sm:$0xff] }
 0x4f7   :  { %677 = vmatpush.msrb.mxu3 %v628_v39  ;;  %660 = vmatpush.msrb.mxu2 %v621_v44  ;;  %v793_v39 = vld [vmem:[#allocation8 + $0x1c8] sm:$0xff] }
 0x4f8   :  { %818 = vmatpush.msra.mxu1 %v794_v37 }
 0x4f9   :  { %678 = vmatpush.msrb.mxu3 %v626_v41 }
 0x4fa   :  { %819 = vmatpush.msra.mxu1 %v793_v39  ;;  %v865_v39 = vld [vmem:[#allocation10 + $0x6] sm:$0x3] }
 0x4fb   :  { %679 = vmatpush.msrb.mxu3 %v624_v43 }
 0x4fd   :  { %680 = vmatpush.msrb.mxu3 %v622_v45 }
 0x553   :  { %v512_v46 = vpop.permute.xlu1 %511 }
 0x554   :  { %v514_v48 = vmul.f32 %v512_v46, %v490_v47  ;;  %v619_v46 = vld [vmem:[#allocation7 + $0x240] sm:$0xff]  ;;  %v620_v47 = vld [vmem:[#allocation7 + $0x248] sm:$0xff] }
 0x555   :  { %661 = vmatpush.msrb.mxu2 %v619_v46  ;;  %681 = vmatpush.msrb.mxu3 %v620_v47  ;;  %v761_v47 = vld [vmem:[#allocation8 + $0x180] sm:$0xff] }
 0x556   :  { %516 = vrot.lane.b32.xlu2 %v514_v48, %s1240_s20  ;;  %v617_v48 = vld [vmem:[#allocation7 + $0x230] sm:$0xff]  ;;  %786 = vmatpush.msra.mxu0 %v761_v47 }
 0x557   :  { %662 = vmatpush.msrb.mxu2 %v617_v48  ;;  %682 = vmatpush.msrb.mxu3 %v618_v49  ;;  %v792_v48 = vld [vmem:[#allocation8 + $0x1c0] sm:$0xff] }
 0x558   :  { %820 = vmatpush.msra.mxu1 %v792_v48 }
 0x559   :  { %663 = vmatpush.msrb.mxu2 %v615_v52  ;;  %683 = vmatpush.msrb.mxu3 %v616_v53 }
 0x55b   :  { %v1336_v11 = vpop.permute.xlu1 %580  ;;  %664 = vmatpush.msrb.mxu2 %v613_v54  ;;  %684 = vmatpush.msrb.mxu3 %v614_v55 }
 0x55c   :  { %1009 = vmatmul.msk.f32.vlgmr.msra.gmra.mxu3 %vm107_vm0, %v1336_v11 }
 0x55d   :  { %665 = vmatpush.msrb.mxu2 %v611_v59  ;;  %685 = vmatpush.msrb.mxu3 %v612_v60 }
 0x5b0   :  { %v517_v3 = vpop.permute.xlu2 %516 }
 0x5b1   :  { %v1331_v4 = vadd.f32 %v517_v3, %v509_v2 }
 0x5b3   :  { %1047 = vtanh.f32 %v1331_v4 }
 0x5b4   :  { %1049 = vpow2.f32 %v1007_v6 }
 0x5b9   :  { %v1048_v5 = vpop.eup %1047 }
 0x5ba   :  { %522 = vrot.lane.b32.xlu0 %v1048_v5, %s1240_s20  ;;  %v1050_v7 = vpop.eup %1049  ;;  %v646_v5 = vperm.slane %v644_v63, 0  ;;  %v862_v63 = vld [vmem:[#allocation7 + $0x3f0] sm:$0xff] }
 0x5bb   :  { %v476_v8 = vadd.f32 1.0, %v1050_v7  ;;  %871 = vmatpush.msrb.mxu0 %v862_v63 }
 0x5bd   :  { %1051 = vrcp.f32 %v476_v8  ;;  %v503_v16 = vand.u32 2147483648, %v476_v8  ;;  %vm497_vm14 = vweird.f32 %v476_v8  ;;  %v501_v17 = vand.u32 2147483647, %v476_v8 }
 0x5bf   :  { %v504_v20 = vor.u32 1.1754944e-38, %v503_v16  ;;  %vm502_vm1 = vcmp.eq.f32.partialorder %v501_v17, 8.507059e+37 }
 0x5c3   :  { %v1052_v51 = vpop.eup %1051 }
 0x5c4   :  { %v493_v12 = vmul.f32 %v1052_v51, %v476_v8  ;;  %vm498_vm13 = vweird.f32 %v1052_v51 }
 0x5c5   :  { %vm499_vm15 = vmor %vm497_vm14, %vm498_vm13 }
 0x5c6   :  { %v494_v13 = vsub.f32 1.0, %v493_v12 }
 0x5c8   :  { %v495_v14 = vmul.f32 %v1052_v51, %v494_v13 }
 0x5ca   :  { %v496_v15 = vadd.f32 %v1052_v51, %v495_v14 }
 0x5cc   :  { %v500_v19 = vsel %vm499_vm15, %v1052_v51, %v496_v15  ;;  %v759_v51 = vld [vmem:[#allocation5 + $0x18] sm:$0xff] }
 0x5cd   :  { %v505_v21 = vsel %vm502_vm1, %v504_v20, %v500_v19 }
 0x5df   :  { %v601_v56 = vpop.f32.mrf.mxu3 }
 0x62c   :  { %v523_v22 = vpop.permute.xlu0 %522 }
 0x62d   :  { %v1340_v23 = vmul.f32 %v523_v22, %v505_v21 }
 0x62f   :  { %1008 = vmatmul.msk.f32.vlgmr.msra.gmra.mxu2 %vm107_vm0, %v1340_v23 }
 0x6b2   :  { %v567_v57 = vpop.f32.mrf.mxu2 }
 0x6b3   :  { %v604_v58 = vmul.f32 %v601_v56, %v567_v57 }
 0x6b5   :  { %606 = vrot.lane.b32.xlu2 %v604_v58, %s1240_s20 }
 0x70f   :  { %v607_v61 = vpop.permute.xlu2 %606 }
 0x710   :  { %v609_v62 = vsel %vm107_vm0, %v1340_v23, %v607_v61 }
 0x711   :  { %666 = vmatmul.f32.vlgmr.msrb.gmra.mxu2 %v609_v62  ;;  %686 = vmatmul.f32.vlgmr.msrb.gmra.mxu3 %v609_v62 }
 0x794   :  { %v687_v1 = vpop.f32.mrf.mxu3  ;;  %v667_v6 = vpop.f32.mrf.mxu2 }
 0x795   :  { %v1347_v2 = vadd.f32 %v687_v1, %v647_v0  ;;  %v668_v7 = vadd.f32 %v667_v6, %v646_v5  ;;  %v863_v0 = vld [vmem:[#allocation7 + $0x3f8] sm:$0xff]  ;;  %v860_v1 = vld [vmem:[#allocation7 + $0x3e0] sm:$0xff] }
 0x796   :  { %891 = vmatpush.msrb.mxu1 %v863_v0  ;;  %v859_v5 = vld [vmem:[#allocation7 + $0x3d8] sm:$0xff]  ;;  %872 = vmatpush.msrb.mxu0 %v860_v1  ;;  %v856_v6 = vld [vmem:[#allocation7 + $0x3c0] sm:$0xff] }
 0x797   :  { %1053 = vtanh.f32 %v1347_v2  ;;  %v1010_v8 = vmul.f32 -1.442695, %v668_v7  ;;  %v1011_v44 = vmul.f32 -1.442695, %v1347_v2  ;;  %v861_v2 = vld [vmem:[#allocation7 + $0x3e8] sm:$0xff] }
 0x798   :  { %892 = vmatpush.msrb.mxu1 %v861_v2  ;;  %v857_v7 = vld [vmem:[#allocation7 + $0x3c8] sm:$0xff] }
 0x799   :  { %1055 = vpow2.f32 %v1010_v8  ;;  %v854_v8 = vld [vmem:[#allocation7 + $0x3b0] sm:$0xff] }
 0x79a   :  { %893 = vmatpush.msrb.mxu1 %v859_v5 }
 0x79c   :  { %894 = vmatpush.msrb.mxu1 %v857_v7 }
 0x79d   :  { %v1054_v3 = vpop.eup %1053 }
 0x79e   :  { %732 = vrot.lane.b32.xlu0 %v1054_v3, %s1240_s20  ;;  %v858_v3 = vld [vmem:[#allocation7 + $0x3d0] sm:$0xff] }
 0x79f   :  { %v1056_v9 = vpop.eup %1055  ;;  %873 = vmatpush.msrb.mxu0 %v858_v3 }
 0x7a0   :  { %v696_v10 = vadd.f32 1.0, %v1056_v9  ;;  %v855_v9 = vld [vmem:[#allocation7 + $0x3b8] sm:$0xff] }
 0x7a1   :  { %874 = vmatpush.msrb.mxu0 %v856_v6  ;;  %895 = vmatpush.msrb.mxu1 %v855_v9 }
 0x7a2   :  { %1057 = vrcp.f32 %v696_v10  ;;  %v709_v17 = vand.u32 2147483648, %v696_v10  ;;  %vm703_vm3 = vweird.f32 %v696_v10  ;;  %v707_v19 = vand.u32 2147483647, %v696_v10 }
 0x7a3   :  { %875 = vmatpush.msrb.mxu0 %v854_v8 }
 0x7a4   :  { %v710_v21 = vor.u32 1.1754944e-38, %v709_v17  ;;  %vm708_vm5 = vcmp.eq.f32.partialorder %v707_v19, 8.507059e+37  ;;  %v847_v17 = vld [vmem:[#allocation7 + $0x378] sm:$0xff]  ;;  %v844_v19 = vld [vmem:[#allocation7 + $0x360] sm:$0xff] }
 0x7a6   :  { %801 = vrot.lane.b32.xlu0 %v759_v51, %s1240_s20  ;;  %v853_v51 = vld [vmem:[#allocation7 + $0x3a8] sm:$0xff] }
 0x7a7   :  { %896 = vmatpush.msrb.mxu1 %v853_v51 }
 0x7a8   :  { %v1058_v12 = vpop.eup %1057 }
 0x7a9   :  { %v699_v13 = vmul.f32 %v1058_v12, %v696_v10  ;;  %vm704_vm2 = vweird.f32 %v1058_v12  ;;  %v852_v10 = vld [vmem:[#allocation7 + $0x3a0] sm:$0xff] }
 0x7aa   :  { %vm705_vm4 = vmor %vm703_vm3, %vm704_vm2  ;;  %876 = vmatpush.msrb.mxu0 %v852_v10 }
 0x7ab   :  { %v700_v14 = vsub.f32 1.0, %v699_v13  ;;  %v851_v13 = vld [vmem:[#allocation7 + $0x398] sm:$0xff] }
 0x7ac   :  { %897 = vmatpush.msrb.mxu1 %v851_v13 }
 0x7ad   :  { %v701_v15 = vmul.f32 %v1058_v12, %v700_v14  ;;  %v848_v14 = vld [vmem:[#allocation7 + $0x380] sm:$0xff] }
 0x7af   :  { %v702_v16 = vadd.f32 %v1058_v12, %v701_v15  ;;  %v849_v15 = vld [vmem:[#allocation7 + $0x388] sm:$0xff] }
 0x7b0   :  { %898 = vmatpush.msrb.mxu1 %v849_v15 }
 0x7b1   :  { %v706_v20 = vsel %vm705_vm4, %v1058_v12, %v702_v16  ;;  %v850_v12 = vld [vmem:[#allocation7 + $0x390] sm:$0xff] }
 0x7b2   :  { %v711_v24 = vsel %vm708_vm5, %v710_v21, %v706_v20  ;;  %877 = vmatpush.msrb.mxu0 %v850_v12  ;;  %v846_v16 = vld [vmem:[#allocation7 + $0x370] sm:$0xff]  ;;  %v845_v20 = vld [vmem:[#allocation7 + $0x368] sm:$0xff]  ;;  %899 = vmatpush.msrb.mxu1 %v847_v17 }
 0x7b3   :  { %v730_v40 = vmul.f32 %v711_v24, %v1336_v11  ;;  %v842_v21 = vld [vmem:[#allocation7 + $0x350] sm:$0xff] }
 0x7b4   :  { %878 = vmatpush.msrb.mxu0 %v848_v14  ;;  %900 = vmatpush.msrb.mxu1 %v845_v20 }
 0x7b6   :  { %879 = vmatpush.msrb.mxu0 %v846_v16 }
 0x7b8   :  { %880 = vmatpush.msrb.mxu0 %v844_v19 }
 0x7ba   :  { %881 = vmatpush.msrb.mxu0 %v842_v21 }
 0x810   :  { %v733_v22 = vpop.permute.xlu0 %732 }
 0x811   :  { %v735_v25 = vmul.f32 %v733_v22, %v711_v24  ;;  %v843_v22 = vld [vmem:[#allocation7 + $0x358] sm:$0xff]  ;;  %v840_v24 = vld [vmem:[#allocation7 + $0x340] sm:$0xff] }
 0x812   :  { %901 = vmatpush.msrb.mxu1 %v843_v22  ;;  %882 = vmatpush.msrb.mxu0 %v840_v24 }
 0x813   :  { %737 = vrot.lane.b32.xlu1 %v735_v25, %s1240_s20  ;;  %v841_v25 = vld [vmem:[#allocation7 + $0x348] sm:$0xff] }
 0x814   :  { %902 = vmatpush.msrb.mxu1 %v841_v25  ;;  %883 = vmatpush.msrb.mxu0 %v838_v26 }
 0x816   :  { %903 = vmatpush.msrb.mxu1 %v839_v27  ;;  %884 = vmatpush.msrb.mxu0 %v836_v28 }
 0x818   :  { %v1359_v49 = vpop.permute.xlu0 %801  ;;  %904 = vmatpush.msrb.mxu1 %v837_v30  ;;  %885 = vmatpush.msrb.mxu0 %v834_v31 }
 0x819   :  { %1013 = vmatmul.msk.f32.vlgmr.msra.gmra.mxu1 %vm107_vm0, %v1359_v49 }
 0x81a   :  { %905 = vmatpush.msrb.mxu1 %v835_v32  ;;  %886 = vmatpush.msrb.mxu0 %v832_v36 }
 0x81c   :  { %906 = vmatpush.msrb.mxu1 %v833_v18 }
 0x885   :  { %v738_v41 = vpop.permute.xlu1 %737 }
 0x886   :  { %v1354_v42 = vadd.f32 %v738_v41, %v730_v40  ;;  %v868_v40 = vperm.slane %v865_v39, 1 }
 0x888   :  { %1059 = vtanh.f32 %v1354_v42 }
 0x889   :  { %1061 = vpow2.f32 %v1011_v44 }
 0x88e   :  { %v1060_v43 = vpop.eup %1059 }
 0x88f   :  { %743 = vrot.lane.b32.xlu2 %v1060_v43, %s1240_s20  ;;  %v1062_v45 = vpop.eup %1061 }
 0x890   :  { %v697_v46 = vadd.f32 1.0, %v1062_v45  ;;  %v867_v45 = vperm.slane %v865_v39, 0 }
 0x892   :  { %1063 = vrcp.f32 %v697_v46  ;;  %v724_v56 = vand.u32 2147483648, %v697_v46  ;;  %vm718_vm7 = vweird.f32 %v697_v46  ;;  %v722_v57 = vand.u32 2147483647, %v697_v46 }
 0x894   :  { %v725_v59 = vor.u32 1.1754944e-38, %v724_v56  ;;  %vm723_vm9 = vcmp.eq.f32.partialorder %v722_v57, 8.507059e+37 }
 0x896   :  { %v822_v33 = vpop.f32.mrf.mxu1 }
 0x898   :  { %v1064_v11 = vpop.eup %1063 }
 0x899   :  { %v714_v52 = vmul.f32 %v1064_v11, %v697_v46  ;;  %vm719_vm6 = vweird.f32 %v1064_v11 }
 0x89a   :  { %vm720_vm8 = vmor %vm718_vm7, %vm719_vm6 }
 0x89b   :  { %v715_v53 = vsub.f32 1.0, %v714_v52 }
 0x89d   :  { %v716_v54 = vmul.f32 %v1064_v11, %v715_v53 }
 0x89f   :  { %v717_v55 = vadd.f32 %v1064_v11, %v716_v54 }
 0x8a1   :  { %v721_v58 = vsel %vm720_vm8, %v1064_v11, %v717_v55 }
 0x8a2   :  { %v726_v60 = vsel %vm723_vm9, %v725_v59, %v721_v58 }
 0x8e9   :  { %v744_v61 = vpop.permute.xlu2 %743 }
 0x8ea   :  { %v1363_v62 = vmul.f32 %v744_v61, %v726_v60 }
 0x8ec   :  { %1012 = vmatmul.msk.f32.vlgmr.msra.gmra.mxu0 %vm107_vm0, %v1363_v62 }
 0x969   :  { %v788_v34 = vpop.f32.mrf.mxu0 }
 0x96a   :  { %v825_v35 = vmul.f32 %v822_v33, %v788_v34 }
 0x96c   :  { %827 = vrot.lane.b32.xlu1 %v825_v35, %s1240_s20 }
 0x9de   :  { %v828_v37 = vpop.permute.xlu1 %827 }
 0x9df   :  { %v830_v38 = vsel %vm107_vm0, %v1363_v62, %v828_v37 }
 0x9e0   :  { %887 = vmatmul.f32.vlgmr.msrb.gmra.mxu0 %v830_v38  ;;  %907 = vmatmul.f32.vlgmr.msrb.gmra.mxu1 %v830_v38 }
 0xa5d   :  { %v908_v41 = vpop.f32.mrf.mxu1  ;;  %v888_v46 = vpop.f32.mrf.mxu0 }
 0xa5e   :  { %v909_v43 = vadd.f32 %v908_v41, %v868_v40  ;;  %v889_v47 = vadd.f32 %v888_v46, %v867_v45 }
 0xa60   :  { %1065 = vtanh.f32 %v909_v43  ;;  %v1014_v48 = vmul.f32 -1.442695, %v889_v47 }
 0xa62   :  { %1067 = vpow2.f32 %v1014_v48 }
 0xa66   :  { %v1066_v44 = vpop.eup %1065 }
 0xa67   :  { %953 = vrot.lane.b32.xlu2 %v1066_v44, %s1240_s20 }
 0xa68   :  { %v1068_v11 = vpop.eup %1067 }
 0xa69   :  { %v917_v52 = vadd.f32 1.0, %v1068_v11 }
 0xa6b   :  { %1069 = vrcp.f32 %v917_v52  ;;  %v930_v58 = vand.u32 2147483648, %v917_v52  ;;  %vm924_vm11 = vweird.f32 %v917_v52 }
 0xa6f   :  { %307 = vrot.lane.b32.xlu2 %v1308_v29, %s1240_s20  ;;  %v928_v29 = vand.u32 2147483647, %v917_v52 }
 0xa71   :  { %v1070_v53 = vpop.eup %1069  ;;  %vm929_vm13 = vcmp.eq.f32.partialorder %v928_v29, 8.507059e+37 }
 0xa72   :  { %v920_v54 = vmul.f32 %v1070_v53, %v917_v52  ;;  %vm925_vm10 = vweird.f32 %v1070_v53 }
 0xa73   :  { %vm926_vm12 = vmor %vm924_vm11, %vm925_vm10 }
 0xa74   :  { %v921_v55 = vsub.f32 1.0, %v920_v54 }
 0xa76   :  { %v922_v56 = vmul.f32 %v1070_v53, %v921_v55 }
 0xa77   :  { %531 = vrot.lane.b32.xlu2 %v1340_v23, %s1240_s20  ;;  %v931_v23 = vor.u32 1.1754944e-38, %v930_v58 }
 0xa78   :  { %v923_v57 = vadd.f32 %v1070_v53, %v922_v56 }
 0xa7a   :  { %v927_v59 = vsel %vm926_vm12, %v1070_v53, %v923_v57 }
 0xa7b   :  { %v932_v61 = vsel %vm929_vm13, %v931_v23, %v927_v59 }
 0xa7c   :  { %v951_v0 = vmul.f32 %v932_v61, %v1359_v49 }
 0xac1   :  { %v954_v60 = vpop.permute.xlu2 %953 }
 0xac2   :  { %v956_v63 = vmul.f32 %v954_v60, %v932_v61 }
 0xac4   :  { %958 = vrot.lane.b32.xlu0 %v956_v63, %s1240_s20 }
 0xac9   :  { %v308_v3 = vpop.permute.xlu2 %307 }
 0xacc   :  { %311 = vrot.lane.b32.xlu0 %v1313_v50, %s1240_s20  ;;  %v1015_v50 = vmul.f32 -1.442695, %v909_v43 }
 0xad1   :  { %v532_v19 = vpop.permute.xlu2 %531 }
 0xad4   :  { %748 = vrot.lane.b32.xlu0 %v1354_v42, %s1240_s20 }
 0xb36   :  { %v959_v1 = vpop.permute.xlu0 %958 }
 0xb37   :  { %v961_v2 = vadd.f32 %v959_v1, %v951_v0 }
 0xb39   :  { %1071 = vtanh.f32 %v961_v2  ;;  %969 = vrot.lane.b32.xlu2 %v961_v2, %s1240_s20 }
 0xb3a   :  { %1073 = vpow2.f32 %v1015_v50 }
 0xb3e   :  { %v312_v5 = vpop.permute.xlu0 %311 }
 0xb3f   :  { %v1072_v6 = vpop.eup %1071  ;;  %v314_v7 = vsel %vm107_vm0, %v308_v3, %v312_v5 }
 0xb40   :  { %315 = vst [vmem:[#allocation11] sm:$0xff] %v314_v7  ;;  %964 = vrot.lane.b32.xlu1 %v1072_v6, %s1240_s20  ;;  %v1074_v42 = vpop.eup %1073 }
 0xb41   :  { %v918_v49 = vadd.f32 1.0, %v1074_v42 }
 0xb43   :  { %1075 = vrcp.f32 %v918_v49  ;;  %v945_v13 = vand.u32 2147483648, %v918_v49  ;;  %vm939_vm15 = vweird.f32 %v918_v49  ;;  %v943_v14 = vand.u32 2147483647, %v918_v49 }
 0xb45   :  { %vm944_vm2 = vcmp.eq.f32.partialorder %v943_v14, 8.507059e+37 }
 0xb46   :  { %v749_v22 = vpop.permute.xlu0 %748 }
 0xb48   :  { %527 = vrot.lane.b32.xlu1 %v1331_v4, %s1240_s20  ;;  %v946_v4 = vor.u32 1.1754944e-38, %v945_v13 }
 0xb49   :  { %v1076_v8 = vpop.eup %1075 }
 0xb4a   :  { %v935_v9 = vmul.f32 %v1076_v8, %v918_v49  ;;  %vm940_vm14 = vweird.f32 %v1076_v8 }
 0xb4b   :  { %vm941_vm1 = vmor %vm939_vm15, %vm940_vm14 }
 0xb4c   :  { %v936_v10 = vsub.f32 1.0, %v935_v9 }
 0xb4e   :  { %v937_v51 = vmul.f32 %v1076_v8, %v936_v10 }
 0xb50   :  { %752 = vrot.lane.b32.xlu1 %v1363_v62, %s1240_s20  ;;  %v938_v12 = vadd.f32 %v1076_v8, %v937_v51 }
 0xb52   :  { %v942_v15 = vsel %vm941_vm1, %v1076_v8, %v938_v12 }
 0xb53   :  { %v947_v16 = vsel %vm944_vm2, %v946_v4, %v942_v15 }
 0xb93   :  { %v970_v26 = vpop.permute.xlu2 %969 }
 0xbb2   :  { %v965_v62 = vpop.permute.xlu1 %964 }
 0xbb3   :  { %v967_v17 = vmul.f32 %v965_v62, %v947_v16 }
 0xbb5   :  { %973 = vrot.lane.b32.xlu0 %v967_v17, %s1240_s20 }
 0xbba   :  { %v528_v20 = vpop.permute.xlu1 %527 }
 0xbbb   :  { %v534_v21 = vsel %vm107_vm0, %v528_v20, %v532_v19 }
 0xbbc   :  { %536 = vst [vmem:[#allocation11 + $0x8] sm:$0xff] %v534_v21 }
 0xbc2   :  { %v753_v24 = vpop.permute.xlu1 %752 }
 0xbc3   :  { %v755_v25 = vsel %vm107_vm0, %v749_v22, %v753_v24 }
 0xbc4   :  { %757 = vst [vmem:[#allocation11 + $0x10] sm:$0xff] %v755_v25 }
 0xc27   :  { %v974_v27 = vpop.permute.xlu0 %973 }
 0xc28   :  { %v976_v28 = vsel %vm107_vm0, %v970_v26, %v974_v27 }
 0xc29   :  { %978 = vst [vmem:[#allocation11 + $0x18] sm:$0xff] %v976_v28 }
 0xc2a   :  { %991 = dma.vmem_to_hbm [thread:$0]  %s984_s21, 512, %s986_s24, [#allocation4], %s1230_s26, %s1230_s26, %s1231_s27  }
 0xc2b   :  { %1227 = dma.done.wait [#allocation4], 512  }
 0xc2c   :  { %1228 = vsyncadd [#allocation4], 4294966784 }
 0xc2d   :  { %996 = vsyncpa [#allocation3], 1 }
 0xc2e   :  { %997 = vsyncpa [#allocation6], 1 }
 0xc2f   :  { %998 = vsyncpa [#allocation9], 1 }
 0xc30   :  { %999 = vsyncpa [#allocation4], 1 }

</bundles_post_ra>
